<compile_context>
chip_gen: v7x
topology: tpu7x:2x2x1
jax: 0.10.0
libtpu: 0.0.40
codegen_flags: <defaults>
</compile_context>

<pallas_src>
import functools
import math

import jax
import jax.numpy as jnp
from jax.experimental import pallas as pl
from jax.experimental.pallas import tpu as pltpu


# ---------------------------------------------------------------------------
# Packed-weight layout: everything lives in ONE (rows, >=128) f32 buffer.
# Gate order along the lane axis is [r | z | n]; weights are pre-transposed so
# `x @ w` computes `x @ W^T` (matching nn.GRU / nn.Linear math).
# ---------------------------------------------------------------------------
def _row_layout(H):
    bias = 6 * H + 8                       # att_wc row block padded to 8 rows
    return {
        "enc_wih": 0,                      # (H, 3H)
        "enc_whh": H,                      # (H, 3H)
        "cmd_wih": 2 * H,                  # (H, 3H)
        "cmd_whh": 3 * H,                  # (H, 3H)
        "st_wih": 4 * H,                   # (H, 3H)   (state GRU W_hh never needed)
        "head": 5 * H,                     # (H, 2)    col0 = att_w_s, col1 = critic_w
        "att_wc": 6 * H,                   # (1, H)
        "bias": bias,                      # +0..+5: enc_bih, enc_bhh, cmd_bih,
                                           #          cmd_bhh, st_bih, st_bhh (each (1,3H))
                                           # +6: lane0 = att_b, lane1 = critic_b
        "total": ((bias + 7 + 7) // 8) * 8,
    }


def _lane_width(H):
    return max(128, ((3 * H + 127) // 128) * 128)


# ---------------------------------------------------------------------------
# In-kernel GRU helper (encoder_gru, cmd_encoder_gru, state_gru).
# Packed gates: one matmul per step; one sigmoid over the first 2H lanes.
# ---------------------------------------------------------------------------
def _gru_last_hidden(w_ref, x_flat, r_wih, r_whh, r_bih, r_bhh, L, N, H):
    """GRU over L timesteps from a zero hidden; returns h_L (N, H).

    x_flat: (L*N, H) f32, timestep t in rows [t*N, (t+1)*N).
    w_ref rows r_wih / r_whh hold (H, 3H) gate-concatenated weights,
    rows r_bih / r_bhh hold (1, 3H) biases.  r_whh is ignored when L == 1
    (hidden projection never needed: h0 == 0).
    """
    wih = w_ref[r_wih:r_wih + H, :].astype(jnp.bfloat16)
    bih = w_ref[r_bih:r_bih + 1, :]
    bhh = w_ref[r_bhh:r_bhh + 1, :]

    # Input projection hoisted out of the recurrence: one matmul over all steps.
    gi = jnp.dot(x_flat.astype(jnp.bfloat16), wih,
                 preferred_element_type=jnp.float32) + bih          # (L*N, LW)

    whh = None
    if L > 1:
        whh = w_ref[r_whh:r_whh + H, :].astype(jnp.bfloat16)

    h = None
    for t in range(L):                       # short static trip count: unrolled
        gi_t = gi[t * N:(t + 1) * N, :]
        if h is None:                        # t == 0: h0 == 0 -> gh == b_hh
            gh = bhh
        else:
            gh = jnp.dot(h.astype(jnp.bfloat16), whh,
                         preferred_element_type=jnp.float32) + bhh  # (N, LW)
        rz = jax.nn.sigmoid(gi_t[:, :2 * H] + gh[:, :2 * H])        # one EUP push
        r = rz[:, :H]
        z = rz[:, H:2 * H]
        n = jnp.tanh(gi_t[:, 2 * H:3 * H] + r * gh[:, 2 * H:3 * H])
        h = (1.0 - z) * n if h is None else (1.0 - z) * n + z * h
    return h                                                         # (N, H)


# ---------------------------------------------------------------------------
# Fully fused scorer kernel: embedding gather -> encoder GRU -> state GRU ->
# merged critic/att heads, cmd GRU, ReLU + softmax, all in one invocation.
# ---------------------------------------------------------------------------
def _scorer_kernel(obs_ids_ref, cmd_ids_ref, emb_ref, w_ref, out_ref,
                   xobs_ref, xcmd_ref, *, L_obs, B, L_cmd, C, H):
    R = _row_layout(H)
    RB = R["bias"]

    # ---- fused embedding gather (token ids read from SMEM, rows from VMEM) --
    for i in range(L_obs * B):
        idx = obs_ids_ref[i]
        xobs_ref[pl.ds(i, 1), :] = emb_ref[pl.ds(idx, 1), :]
    for i in range(L_cmd * C):
        idx = cmd_ids_ref[i]
        xcmd_ref[pl.ds(i, 1), :] = emb_ref[pl.ds(idx, 1), :]

    # ---- encoder_gru over the observation sequence -> (B, H) ----------------
    enc_h = _gru_last_hidden(w_ref, xobs_ref[...], R["enc_wih"], R["enc_whh"],
                             RB + 0, RB + 1, L_obs, B, H)
    # ---- cmd_encoder_gru over every command token sequence -> (C, H) --------
    cmd_h = _gru_last_hidden(w_ref, xcmd_ref[...], R["cmd_wih"], R["cmd_whh"],
                             RB + 2, RB + 3, L_cmd, C, H)
    # ---- state_gru: one step from zero hidden (reset_hidden(1)) -> (B, H) ---
    state_h = _gru_last_hidden(w_ref, enc_h, R["st_wih"], -1,
                               RB + 4, RB + 5, 1, B, H)

    # ---- merged heads: one matmul gives [s_state | value_pre] ---------------
    head_w = w_ref[R["head"]:R["head"] + H, :].astype(jnp.bfloat16)
    head = jnp.dot(state_h.astype(jnp.bfloat16), head_w,
                   preferred_element_type=jnp.float32)               # (B, LW)
    s_state = head[:, 0:1]                                           # (B, 1)
    value = head[:, 1:2] + w_ref[RB + 6:RB + 7, 1:2]                 # (B, 1)

    # att_cmd(cat([state, cmd], -1)) decomposed over the concat:
    #   scores[b, c] = relu(state[b].w_s + cmds[c].w_c + b_att)
    att_wc = w_ref[R["att_wc"]:R["att_wc"] + 1, 0:H].astype(jnp.bfloat16)
    s_cmd = jax.lax.dot_general(                                     # (1, C)
        att_wc, cmd_h.astype(jnp.bfloat16),
        dimension_numbers=(((1,), (1,)), ((), ())),
        preferred_element_type=jnp.float32)
    att_b = w_ref[RB + 6:RB + 7, 0:1]
    scores = jnp.maximum(s_state + s_cmd + att_b, 0.0)               # (B, C)

    # softmax over commands (EXACT reciprocal: these feed PPO importance ratios)
    m = jnp.max(scores, axis=-1, keepdims=True)
    e = jnp.exp(scores - m)
    probs = e / jnp.sum(e, axis=-1, keepdims=True)

    # single packed output store: rows [0,B)=scores, [B,2B)=probs, [2B,3B)=value
    out_ref[...] = jnp.concatenate(
        [scores, probs, jnp.broadcast_to(value, (B, C))], axis=0)


def _scorer_call(emb, w_pack, obs_ids, cmd_ids, L_obs, B, L_cmd, C, H):
    kernel = functools.partial(_scorer_kernel,
                               L_obs=L_obs, B=B, L_cmd=L_cmd, C=C, H=H)
    # Everything fits VMEM trivially; one no-grid invocation, 4 input DMAs
    # (two of them tiny SMEM id vectors) and 1 output store.
    return pl.pallas_call(
        kernel,
        out_shape=jax.ShapeDtypeStruct((3 * B, C), jnp.float32),
        in_specs=[
            pl.BlockSpec(memory_space=pltpu.MemorySpace.SMEM),   # obs token ids
            pl.BlockSpec(memory_space=pltpu.MemorySpace.SMEM),   # cmd token ids
            pl.BlockSpec(memory_space=pltpu.MemorySpace.VMEM),   # embedding table
            pl.BlockSpec(memory_space=pltpu.MemorySpace.VMEM),   # packed weights
        ],
        out_specs=pl.BlockSpec(memory_space=pltpu.MemorySpace.VMEM),
        scratch_shapes=[
            pltpu.VMEM((L_obs * B, H), jnp.float32),   # gathered obs embeddings
            pltpu.VMEM((L_cmd * C, H), jnp.float32),   # gathered cmd embeddings
        ],
    )(obs_ids, cmd_ids, emb, w_pack)


# ---------------------------------------------------------------------------
# Parameter init (deterministic, PyTorch-like uniform bounds).
# Logical params are gate-major / pre-transposed; pack_params() builds the
# single kernel weight buffer once, off the hot path.
# ---------------------------------------------------------------------------
def init_params(key, vocab_size, hidden_size):
    H = hidden_size
    ks = jax.random.split(key, 17)
    gru_b = 1.0 / math.sqrt(H)
    att_b = 1.0 / math.sqrt(2 * H)
    crit_b = 1.0 / math.sqrt(H)

    def u(k, shape, bound):
        return jax.random.uniform(k, shape, jnp.float32, -bound, bound)

    return {
        "embedding": jax.random.normal(ks[0], (vocab_size, H), jnp.float32),
        "enc_wih": u(ks[1], (3, H, H), gru_b),
        "enc_whh": u(ks[2], (3, H, H), gru_b),
        "enc_bih": u(ks[3], (3, 1, H), gru_b),
        "enc_bhh": u(ks[4], (3, 1, H), gru_b),
        "cmd_wih": u(ks[5], (3, H, H), gru_b),
        "cmd_whh": u(ks[6], (3, H, H), gru_b),
        "cmd_bih": u(ks[7], (3, 1, H), gru_b),
        "cmd_bhh": u(ks[8], (3, 1, H), gru_b),
        "st_wih": u(ks[9], (3, H, H), gru_b),
        "st_bih": u(ks[10], (3, 1, H), gru_b),
        "st_bhh": u(ks[11], (3, 1, H), gru_b),
        "critic_w": u(ks[12], (H, 1), crit_b),
        "critic_b": u(ks[13], (1, 1), crit_b),
        "att_w_s": u(ks[14], (H, 1), att_b),
        "att_w_c": u(ks[15], (1, H), att_b),
        "att_b": u(ks[16], (1, 1), att_b),
    }


def pack_params(params):
    # TODO(synk): if real PyTorch nn.GRU/nn.Linear checkpoints are loaded, the
    # (3H, H) stacked weights must be split and transposed before packing.
    H = params["att_w_s"].shape[0]
    G = 3 * H
    R = _row_layout(H)
    w = jnp.zeros((R["total"], _lane_width(H)), jnp.float32)

    def cat_w(p):   # (3, H, H) -> (H, 3H)
        return jnp.concatenate([p[0], p[1], p[2]], axis=1)

    def cat_b(p):   # (3, 1, H) -> (3H,)
        return jnp.concatenate([p[0], p[1], p[2]], axis=1)[0]

    w = w.at[R["enc_wih"]:R["enc_wih"] + H, :G].set(cat_w(params["enc_wih"]))
    w = w.at[R["enc_whh"]:R["enc_whh"] + H, :G].set(cat_w(params["enc_whh"]))
    w = w.at[R["cmd_wih"]:R["cmd_wih"] + H, :G].set(cat_w(params["cmd_wih"]))
    w = w.at[R["cmd_whh"]:R["cmd_whh"] + H, :G].set(cat_w(params["cmd_whh"]))
    w = w.at[R["st_wih"]:R["st_wih"] + H, :G].set(cat_w(params["st_wih"]))
    w = w.at[R["head"]:R["head"] + H, 0:1].set(params["att_w_s"])
    w = w.at[R["head"]:R["head"] + H, 1:2].set(params["critic_w"])
    w = w.at[R["att_wc"], 0:H].set(params["att_w_c"][0])
    b = R["bias"]
    w = w.at[b + 0, :G].set(cat_b(params["enc_bih"]))
    w = w.at[b + 1, :G].set(cat_b(params["enc_bhh"]))
    w = w.at[b + 2, :G].set(cat_b(params["cmd_bih"]))
    w = w.at[b + 3, :G].set(cat_b(params["cmd_bhh"]))
    w = w.at[b + 4, :G].set(cat_b(params["st_bih"]))
    w = w.at[b + 5, :G].set(cat_b(params["st_bhh"]))
    w = w.at[b + 6, 0].set(params["att_b"][0, 0])
    w = w.at[b + 6, 1].set(params["critic_b"][0, 0])
    return w


# ---------------------------------------------------------------------------
# Full forward, mirroring CommandScorer.forward.
# obs: (L_obs, B) int32, commands: (L_cmd, C) int32.  As in the PyTorch module
# (reset_hidden(1) before state_gru), B must be 1.
# ---------------------------------------------------------------------------
def command_scorer_forward(embedding, w_pack, obs, commands, sample_key):
    L_obs, B = obs.shape
    L_cmd, C = commands.shape
    H = embedding.shape[1]

    out = _scorer_call(embedding, w_pack,
                       obs.reshape(-1).astype(jnp.int32),
                       commands.reshape(-1).astype(jnp.int32),
                       L_obs, B, L_cmd, C, H)

    scores_bc = out[0:B]                 # (B, C)
    probs_bc = out[B:2 * B]              # (B, C)
    value_b1 = out[2 * B:3 * B, 0:1]     # (B, 1)

    scores = scores_bc[None]             # (1, B, C)
    probs = probs_bc[None]               # (1, B, C)
    value = value_b1[None]               # (1, B, 1)

    # TODO(synk): torch.multinomial done with jax.random.categorical (same
    # distribution: categorical over logits==scores == multinomial over probs).
    idx = jax.random.categorical(sample_key, scores_bc, axis=-1)   # (B,)
    index = idx[None, :, None]                                     # (1, B, 1)
    return scores, index, value, probs


# ---------------------------------------------------------------------------
# Pure-JAX f32 reference (for correctness checking only).
# ---------------------------------------------------------------------------
def _forward_reference(params, obs, commands):
    emb = params["embedding"]
    H = emb.shape[1]

    def gru_ref(x_seq, wih, whh, bih, bhh):
        L, N, _ = x_seq.shape
        h = jnp.zeros((N, H), jnp.float32)
        for t in range(L):
            r = jax.nn.sigmoid(x_seq[t] @ wih[0] + bih[0] + h @ whh[0] + bhh[0])
            z = jax.nn.sigmoid(x_seq[t] @ wih[1] + bih[1] + h @ whh[1] + bhh[1])
            n = jnp.tanh(x_seq[t] @ wih[2] + bih[2] + r * (h @ whh[2] + bhh[2]))
            h = (1.0 - z) * n + z * h
        return h

    x_obs = jnp.take(emb, obs, axis=0)
    x_cmd = jnp.take(emb, commands, axis=0)
    enc_h = gru_ref(x_obs, params["enc_wih"], params["enc_whh"],
                    params["enc_bih"], params["enc_bhh"])
    cmd_h = gru_ref(x_cmd, params["cmd_wih"], params["cmd_whh"],
                    params["cmd_bih"], params["cmd_bhh"])
    r = jax.nn.sigmoid(enc_h @ params["st_wih"][0] + params["st_bih"][0] + params["st_bhh"][0])
    z = jax.nn.sigmoid(enc_h @ params["st_wih"][1] + params["st_bih"][1] + params["st_bhh"][1])
    n = jnp.tanh(enc_h @ params["st_wih"][2] + params["st_bih"][2] + r * params["st_bhh"][2])
    state_h = (1.0 - z) * n
    value = state_h @ params["critic_w"] + params["critic_b"]
    scores = jnp.maximum(state_h @ params["att_w_s"]
                         + (cmd_h @ params["att_w_c"].T).T
                         + params["att_b"], 0.0)
    probs = jax.nn.softmax(scores, axis=-1)
    return scores, value, probs


if __name__ == "__main__":
    vocab_size = 100
    hidden_size = 32
    seq_obs, batch = 6, 1
    seq_cmd, nb_cmds = 5, 8

    key = jax.random.PRNGKey(0)
    pkey, okey, ckey, skey = jax.random.split(key, 4)

    params = init_params(pkey, vocab_size, hidden_size)
    w_pack = pack_params(params)          # one-time packing, off the hot path
    obs = jax.random.randint(okey, (seq_obs, batch), 0, vocab_size, dtype=jnp.int32)
    commands = jax.random.randint(ckey, (seq_cmd, nb_cmds), 0, vocab_size, dtype=jnp.int32)

    scores, index, value, probs = command_scorer_forward(
        params["embedding"], w_pack, obs, commands, skey)
    jax.block_until_ready((scores, index, value, probs))

    assert scores.shape == (1, batch, nb_cmds)
    assert probs.shape == (1, batch, nb_cmds)
    assert value.shape == (1, batch, 1)
    assert index.shape == (1, batch, 1)

    # correctness vs. pure-f32 JAX reference (loose tol: bf16 MXU operands)
    ref_scores, ref_value, ref_probs = _forward_reference(params, obs, commands)
    assert jnp.allclose(scores[0], ref_scores, atol=5e-2), "scores mismatch"
    assert jnp.allclose(value[0], ref_value, atol=5e-2), "value mismatch"
    assert jnp.allclose(probs[0], ref_probs, atol=5e-2), "probs mismatch"

    print("KERNEL_OK")
</pallas_src>

<mosaic_0001>
module attributes {stable_mosaic.version = 11 : i64} {
  func.func @_scorer_kernel(%arg0: memref<6xi32, #tpu.memory_space<smem>>, %arg1: memref<40xi32, #tpu.memory_space<smem>>, %arg2: memref<100x32xf32, #tpu.memory_space<vmem>>, %arg3: memref<208x128xf32, #tpu.memory_space<vmem>>, %arg4: memref<3x8xf32, #tpu.memory_space<vmem>>, %arg5: memref<6x32xf32, #tpu.memory_space<vmem>>, %arg6: memref<40x32xf32, #tpu.memory_space<vmem>>) attributes {dimension_semantics = [], scalar_prefetch = 0 : i64, scratch_operands = 2 : i64, tpu.core_type = #tpu.core_type<tc>} {
    %c0 = arith.constant 0 : index
    %0 = memref.load %arg0[%c0] : memref<6xi32, #tpu.memory_space<smem>>
    %1 = arith.index_cast %0 : i32 to index
    %c0_0 = arith.constant 0 : index
    %2 = vector.load %arg2[%1, %c0_0] : memref<100x32xf32, #tpu.memory_space<vmem>>, vector<1x32xf32>
    %c0_1 = arith.constant 0 : index
    %c0_2 = arith.constant 0 : index
    %3 = vector.load %arg5[%c0_1, %c0_2] : memref<6x32xf32, #tpu.memory_space<vmem>>, vector<1x32xf32>
    tpu.vector_store %arg5[%c0_1, %c0_2], %2 {strides = array<i32>} : memref<6x32xf32, #tpu.memory_space<vmem>>, vector<1x32xf32>,
    %c1 = arith.constant 1 : index
    %4 = memref.load %arg0[%c1] : memref<6xi32, #tpu.memory_space<smem>>
    %5 = arith.index_cast %4 : i32 to index
    %c0_3 = arith.constant 0 : index
    %6 = vector.load %arg2[%5, %c0_3] : memref<100x32xf32, #tpu.memory_space<vmem>>, vector<1x32xf32>
    %c1_4 = arith.constant 1 : index
    %c0_5 = arith.constant 0 : index
    %7 = vector.load %arg5[%c1_4, %c0_5] : memref<6x32xf32, #tpu.memory_space<vmem>>, vector<1x32xf32>
    tpu.vector_store %arg5[%c1_4, %c0_5], %6 {strides = array<i32>} : memref<6x32xf32, #tpu.memory_space<vmem>>, vector<1x32xf32>,
    %c2 = arith.constant 2 : index
    %8 = memref.load %arg0[%c2] : memref<6xi32, #tpu.memory_space<smem>>
    %9 = arith.index_cast %8 : i32 to index
    %c0_6 = arith.constant 0 : index
    %10 = vector.load %arg2[%9, %c0_6] : memref<100x32xf32, #tpu.memory_space<vmem>>, vector<1x32xf32>
    %c2_7 = arith.constant 2 : index
    %c0_8 = arith.constant 0 : index
    %11 = vector.load %arg5[%c2_7, %c0_8] : memref<6x32xf32, #tpu.memory_space<vmem>>, vector<1x32xf32>
    tpu.vector_store %arg5[%c2_7, %c0_8], %10 {strides = array<i32>} : memref<6x32xf32, #tpu.memory_space<vmem>>, vector<1x32xf32>,
    %c3 = arith.constant 3 : index
    %12 = memref.load %arg0[%c3] : memref<6xi32, #tpu.memory_space<smem>>
    %13 = arith.index_cast %12 : i32 to index
    %c0_9 = arith.constant 0 : index
    %14 = vector.load %arg2[%13, %c0_9] : memref<100x32xf32, #tpu.memory_space<vmem>>, vector<1x32xf32>
    %c3_10 = arith.constant 3 : index
    %c0_11 = arith.constant 0 : index
    %15 = vector.load %arg5[%c3_10, %c0_11] : memref<6x32xf32, #tpu.memory_space<vmem>>, vector<1x32xf32>
    tpu.vector_store %arg5[%c3_10, %c0_11], %14 {strides = array<i32>} : memref<6x32xf32, #tpu.memory_space<vmem>>, vector<1x32xf32>,
    %c4 = arith.constant 4 : index
    %16 = memref.load %arg0[%c4] : memref<6xi32, #tpu.memory_space<smem>>
    %17 = arith.index_cast %16 : i32 to index
    %c0_12 = arith.constant 0 : index
    %18 = vector.load %arg2[%17, %c0_12] : memref<100x32xf32, #tpu.memory_space<vmem>>, vector<1x32xf32>
    %c4_13 = arith.constant 4 : index
    %c0_14 = arith.constant 0 : index
    %19 = vector.load %arg5[%c4_13, %c0_14] : memref<6x32xf32, #tpu.memory_space<vmem>>, vector<1x32xf32>
    tpu.vector_store %arg5[%c4_13, %c0_14], %18 {strides = array<i32>} : memref<6x32xf32, #tpu.memory_space<vmem>>, vector<1x32xf32>,
    %c5 = arith.constant 5 : index
    %20 = memref.load %arg0[%c5] : memref<6xi32, #tpu.memory_space<smem>>
    %21 = arith.index_cast %20 : i32 to index
    %c0_15 = arith.constant 0 : index
    %22 = vector.load %arg2[%21, %c0_15] : memref<100x32xf32, #tpu.memory_space<vmem>>, vector<1x32xf32>
    %c5_16 = arith.constant 5 : index
    %c0_17 = arith.constant 0 : index
    %23 = vector.load %arg5[%c5_16, %c0_17] : memref<6x32xf32, #tpu.memory_space<vmem>>, vector<1x32xf32>
    tpu.vector_store %arg5[%c5_16, %c0_17], %22 {strides = array<i32>} : memref<6x32xf32, #tpu.memory_space<vmem>>, vector<1x32xf32>,
    %c0_18 = arith.constant 0 : index
    %24 = memref.load %arg1[%c0_18] : memref<40xi32, #tpu.memory_space<smem>>
    %25 = arith.index_cast %24 : i32 to index
    %c0_19 = arith.constant 0 : index
    %26 = vector.load %arg2[%25, %c0_19] : memref<100x32xf32, #tpu.memory_space<vmem>>, vector<1x32xf32>
    %c0_20 = arith.constant 0 : index
    %c0_21 = arith.constant 0 : index
    %27 = vector.load %arg6[%c0_20, %c0_21] : memref<40x32xf32, #tpu.memory_space<vmem>>, vector<1x32xf32>
    tpu.vector_store %arg6[%c0_20, %c0_21], %26 {strides = array<i32>} : memref<40x32xf32, #tpu.memory_space<vmem>>, vector<1x32xf32>,
    %c1_22 = arith.constant 1 : index
    %28 = memref.load %arg1[%c1_22] : memref<40xi32, #tpu.memory_space<smem>>
    %29 = arith.index_cast %28 : i32 to index
    %c0_23 = arith.constant 0 : index
    %30 = vector.load %arg2[%29, %c0_23] : memref<100x32xf32, #tpu.memory_space<vmem>>, vector<1x32xf32>
    %c1_24 = arith.constant 1 : index
    %c0_25 = arith.constant 0 : index
    %31 = vector.load %arg6[%c1_24, %c0_25] : memref<40x32xf32, #tpu.memory_space<vmem>>, vector<1x32xf32>
    tpu.vector_store %arg6[%c1_24, %c0_25], %30 {strides = array<i32>} : memref<40x32xf32, #tpu.memory_space<vmem>>, vector<1x32xf32>,
    %c2_26 = arith.constant 2 : index
    %32 = memref.load %arg1[%c2_26] : memref<40xi32, #tpu.memory_space<smem>>
    %33 = arith.index_cast %32 : i32 to index
    %c0_27 = arith.constant 0 : index
    %34 = vector.load %arg2[%33, %c0_27] : memref<100x32xf32, #tpu.memory_space<vmem>>, vector<1x32xf32>
    %c2_28 = arith.constant 2 : index
    %c0_29 = arith.constant 0 : index
    %35 = vector.load %arg6[%c2_28, %c0_29] : memref<40x32xf32, #tpu.memory_space<vmem>>, vector<1x32xf32>
    tpu.vector_store %arg6[%c2_28, %c0_29], %34 {strides = array<i32>} : memref<40x32xf32, #tpu.memory_space<vmem>>, vector<1x32xf32>,
    %c3_30 = arith.constant 3 : index
    %36 = memref.load %arg1[%c3_30] : memref<40xi32, #tpu.memory_space<smem>>
    %37 = arith.index_cast %36 : i32 to index
    %c0_31 = arith.constant 0 : index
    %38 = vector.load %arg2[%37, %c0_31] : memref<100x32xf32, #tpu.memory_space<vmem>>, vector<1x32xf32>
    %c3_32 = arith.constant 3 : index
    %c0_33 = arith.constant 0 : index
    %39 = vector.load %arg6[%c3_32, %c0_33] : memref<40x32xf32, #tpu.memory_space<vmem>>, vector<1x32xf32>
    tpu.vector_store %arg6[%c3_32, %c0_33], %38 {strides = array<i32>} : memref<40x32xf32, #tpu.memory_space<vmem>>, vector<1x32xf32>,
    %c4_34 = arith.constant 4 : index
    %40 = memref.load %arg1[%c4_34] : memref<40xi32, #tpu.memory_space<smem>>
    %41 = arith.index_cast %40 : i32 to index
    %c0_35 = arith.constant 0 : index
    %42 = vector.load %arg2[%41, %c0_35] : memref<100x32xf32, #tpu.memory_space<vmem>>, vector<1x32xf32>
    %c4_36 = arith.constant 4 : index
    %c0_37 = arith.constant 0 : index
    %43 = vector.load %arg6[%c4_36, %c0_37] : memref<40x32xf32, #tpu.memory_space<vmem>>, vector<1x32xf32>
    tpu.vector_store %arg6[%c4_36, %c0_37], %42 {strides = array<i32>} : memref<40x32xf32, #tpu.memory_space<vmem>>, vector<1x32xf32>,
    %c5_38 = arith.constant 5 : index
    %44 = memref.load %arg1[%c5_38] : memref<40xi32, #tpu.memory_space<smem>>
    %45 = arith.index_cast %44 : i32 to index
    %c0_39 = arith.constant 0 : index
    %46 = vector.load %arg2[%45, %c0_39] : memref<100x32xf32, #tpu.memory_space<vmem>>, vector<1x32xf32>
    %c5_40 = arith.constant 5 : index
    %c0_41 = arith.constant 0 : index
    %47 = vector.load %arg6[%c5_40, %c0_41] : memref<40x32xf32, #tpu.memory_space<vmem>>, vector<1x32xf32>
    tpu.vector_store %arg6[%c5_40, %c0_41], %46 {strides = array<i32>} : memref<40x32xf32, #tpu.memory_space<vmem>>, vector<1x32xf32>,
    %c6 = arith.constant 6 : index
    %48 = memref.load %arg1[%c6] : memref<40xi32, #tpu.memory_space<smem>>
    %49 = arith.index_cast %48 : i32 to index
    %c0_42 = arith.constant 0 : index
    %50 = vector.load %arg2[%49, %c0_42] : memref<100x32xf32, #tpu.memory_space<vmem>>, vector<1x32xf32>
    %c6_43 = arith.constant 6 : index
    %c0_44 = arith.constant 0 : index
    %51 = vector.load %arg6[%c6_43, %c0_44] : memref<40x32xf32, #tpu.memory_space<vmem>>, vector<1x32xf32>
    tpu.vector_store %arg6[%c6_43, %c0_44], %50 {strides = array<i32>} : memref<40x32xf32, #tpu.memory_space<vmem>>, vector<1x32xf32>,
    %c7 = arith.constant 7 : index
    %52 = memref.load %arg1[%c7] : memref<40xi32, #tpu.memory_space<smem>>
    %53 = arith.index_cast %52 : i32 to index
    %c0_45 = arith.constant 0 : index
    %54 = vector.load %arg2[%53, %c0_45] : memref<100x32xf32, #tpu.memory_space<vmem>>, vector<1x32xf32>
    %c7_46 = arith.constant 7 : index
    %c0_47 = arith.constant 0 : index
    %55 = vector.load %arg6[%c7_46, %c0_47] : memref<40x32xf32, #tpu.memory_space<vmem>>, vector<1x32xf32>
    tpu.vector_store %arg6[%c7_46, %c0_47], %54 {strides = array<i32>} : memref<40x32xf32, #tpu.memory_space<vmem>>, vector<1x32xf32>,
    %c8 = arith.constant 8 : index
    %56 = memref.load %arg1[%c8] : memref<40xi32, #tpu.memory_space<smem>>
    %57 = arith.index_cast %56 : i32 to index
    %c0_48 = arith.constant 0 : index
    %58 = vector.load %arg2[%57, %c0_48] : memref<100x32xf32, #tpu.memory_space<vmem>>, vector<1x32xf32>
    %c8_49 = arith.constant 8 : index
    %c0_50 = arith.constant 0 : index
    %59 = vector.load %arg6[%c8_49, %c0_50] : memref<40x32xf32, #tpu.memory_space<vmem>>, vector<1x32xf32>
    tpu.vector_store %arg6[%c8_49, %c0_50], %58 {strides = array<i32>} : memref<40x32xf32, #tpu.memory_space<vmem>>, vector<1x32xf32>,
    %c9 = arith.constant 9 : index
    %60 = memref.load %arg1[%c9] : memref<40xi32, #tpu.memory_space<smem>>
    %61 = arith.index_cast %60 : i32 to index
    %c0_51 = arith.constant 0 : index
    %62 = vector.load %arg2[%61, %c0_51] : memref<100x32xf32, #tpu.memory_space<vmem>>, vector<1x32xf32>
    %c9_52 = arith.constant 9 : index
    %c0_53 = arith.constant 0 : index
    %63 = vector.load %arg6[%c9_52, %c0_53] : memref<40x32xf32, #tpu.memory_space<vmem>>, vector<1x32xf32>
    tpu.vector_store %arg6[%c9_52, %c0_53], %62 {strides = array<i32>} : memref<40x32xf32, #tpu.memory_space<vmem>>, vector<1x32xf32>,
    %c10 = arith.constant 10 : index
    %64 = memref.load %arg1[%c10] : memref<40xi32, #tpu.memory_space<smem>>
    %65 = arith.index_cast %64 : i32 to index
    %c0_54 = arith.constant 0 : index
    %66 = vector.load %arg2[%65, %c0_54] : memref<100x32xf32, #tpu.memory_space<vmem>>, vector<1x32xf32>
    %c10_55 = arith.constant 10 : index
    %c0_56 = arith.constant 0 : index
    %67 = vector.load %arg6[%c10_55, %c0_56] : memref<40x32xf32, #tpu.memory_space<vmem>>, vector<1x32xf32>
    tpu.vector_store %arg6[%c10_55, %c0_56], %66 {strides = array<i32>} : memref<40x32xf32, #tpu.memory_space<vmem>>, vector<1x32xf32>,
    %c11 = arith.constant 11 : index
    %68 = memref.load %arg1[%c11] : memref<40xi32, #tpu.memory_space<smem>>
    %69 = arith.index_cast %68 : i32 to index
    %c0_57 = arith.constant 0 : index
    %70 = vector.load %arg2[%69, %c0_57] : memref<100x32xf32, #tpu.memory_space<vmem>>, vector<1x32xf32>
    %c11_58 = arith.constant 11 : index
    %c0_59 = arith.constant 0 : index
    %71 = vector.load %arg6[%c11_58, %c0_59] : memref<40x32xf32, #tpu.memory_space<vmem>>, vector<1x32xf32>
    tpu.vector_store %arg6[%c11_58, %c0_59], %70 {strides = array<i32>} : memref<40x32xf32, #tpu.memory_space<vmem>>, vector<1x32xf32>,
    %c12 = arith.constant 12 : index
    %72 = memref.load %arg1[%c12] : memref<40xi32, #tpu.memory_space<smem>>
    %73 = arith.index_cast %72 : i32 to index
    %c0_60 = arith.constant 0 : index
    %74 = vector.load %arg2[%73, %c0_60] : memref<100x32xf32, #tpu.memory_space<vmem>>, vector<1x32xf32>
    %c12_61 = arith.constant 12 : index
    %c0_62 = arith.constant 0 : index
    %75 = vector.load %arg6[%c12_61, %c0_62] : memref<40x32xf32, #tpu.memory_space<vmem>>, vector<1x32xf32>
    tpu.vector_store %arg6[%c12_61, %c0_62], %74 {strides = array<i32>} : memref<40x32xf32, #tpu.memory_space<vmem>>, vector<1x32xf32>,
    %c13 = arith.constant 13 : index
    %76 = memref.load %arg1[%c13] : memref<40xi32, #tpu.memory_space<smem>>
    %77 = arith.index_cast %76 : i32 to index
    %c0_63 = arith.constant 0 : index
    %78 = vector.load %arg2[%77, %c0_63] : memref<100x32xf32, #tpu.memory_space<vmem>>, vector<1x32xf32>
    %c13_64 = arith.constant 13 : index
    %c0_65 = arith.constant 0 : index
    %79 = vector.load %arg6[%c13_64, %c0_65] : memref<40x32xf32, #tpu.memory_space<vmem>>, vector<1x32xf32>
    tpu.vector_store %arg6[%c13_64, %c0_65], %78 {strides = array<i32>} : memref<40x32xf32, #tpu.memory_space<vmem>>, vector<1x32xf32>,
    %c14 = arith.constant 14 : index
    %80 = memref.load %arg1[%c14] : memref<40xi32, #tpu.memory_space<smem>>
    %81 = arith.index_cast %80 : i32 to index
    %c0_66 = arith.constant 0 : index
    %82 = vector.load %arg2[%81, %c0_66] : memref<100x32xf32, #tpu.memory_space<vmem>>, vector<1x32xf32>
    %c14_67 = arith.constant 14 : index
    %c0_68 = arith.constant 0 : index
    %83 = vector.load %arg6[%c14_67, %c0_68] : memref<40x32xf32, #tpu.memory_space<vmem>>, vector<1x32xf32>
    tpu.vector_store %arg6[%c14_67, %c0_68], %82 {strides = array<i32>} : memref<40x32xf32, #tpu.memory_space<vmem>>, vector<1x32xf32>,
    %c15 = arith.constant 15 : index
    %84 = memref.load %arg1[%c15] : memref<40xi32, #tpu.memory_space<smem>>
    %85 = arith.index_cast %84 : i32 to index
    %c0_69 = arith.constant 0 : index
    %86 = vector.load %arg2[%85, %c0_69] : memref<100x32xf32, #tpu.memory_space<vmem>>, vector<1x32xf32>
    %c15_70 = arith.constant 15 : index
    %c0_71 = arith.constant 0 : index
    %87 = vector.load %arg6[%c15_70, %c0_71] : memref<40x32xf32, #tpu.memory_space<vmem>>, vector<1x32xf32>
    tpu.vector_store %arg6[%c15_70, %c0_71], %86 {strides = array<i32>} : memref<40x32xf32, #tpu.memory_space<vmem>>, vector<1x32xf32>,
    %c16 = arith.constant 16 : index
    %88 = memref.load %arg1[%c16] : memref<40xi32, #tpu.memory_space<smem>>
    %89 = arith.index_cast %88 : i32 to index
    %c0_72 = arith.constant 0 : index
    %90 = vector.load %arg2[%89, %c0_72] : memref<100x32xf32, #tpu.memory_space<vmem>>, vector<1x32xf32>
    %c16_73 = arith.constant 16 : index
    %c0_74 = arith.constant 0 : index
    %91 = vector.load %arg6[%c16_73, %c0_74] : memref<40x32xf32, #tpu.memory_space<vmem>>, vector<1x32xf32>
    tpu.vector_store %arg6[%c16_73, %c0_74], %90 {strides = array<i32>} : memref<40x32xf32, #tpu.memory_space<vmem>>, vector<1x32xf32>,
    %c17 = arith.constant 17 : index
    %92 = memref.load %arg1[%c17] : memref<40xi32, #tpu.memory_space<smem>>
    %93 = arith.index_cast %92 : i32 to index
    %c0_75 = arith.constant 0 : index
    %94 = vector.load %arg2[%93, %c0_75] : memref<100x32xf32, #tpu.memory_space<vmem>>, vector<1x32xf32>
    %c17_76 = arith.constant 17 : index
    %c0_77 = arith.constant 0 : index
    %95 = vector.load %arg6[%c17_76, %c0_77] : memref<40x32xf32, #tpu.memory_space<vmem>>, vector<1x32xf32>
    tpu.vector_store %arg6[%c17_76, %c0_77], %94 {strides = array<i32>} : memref<40x32xf32, #tpu.memory_space<vmem>>, vector<1x32xf32>,
    %c18 = arith.constant 18 : index
    %96 = memref.load %arg1[%c18] : memref<40xi32, #tpu.memory_space<smem>>
    %97 = arith.index_cast %96 : i32 to index
    %c0_78 = arith.constant 0 : index
    %98 = vector.load %arg2[%97, %c0_78] : memref<100x32xf32, #tpu.memory_space<vmem>>, vector<1x32xf32>
    %c18_79 = arith.constant 18 : index
    %c0_80 = arith.constant 0 : index
    %99 = vector.load %arg6[%c18_79, %c0_80] : memref<40x32xf32, #tpu.memory_space<vmem>>, vector<1x32xf32>
    tpu.vector_store %arg6[%c18_79, %c0_80], %98 {strides = array<i32>} : memref<40x32xf32, #tpu.memory_space<vmem>>, vector<1x32xf32>,
    %c19 = arith.constant 19 : index
    %100 = memref.load %arg1[%c19] : memref<40xi32, #tpu.memory_space<smem>>
    %101 = arith.index_cast %100 : i32 to index
    %c0_81 = arith.constant 0 : index
    %102 = vector.load %arg2[%101, %c0_81] : memref<100x32xf32, #tpu.memory_space<vmem>>, vector<1x32xf32>
    %c19_82 = arith.constant 19 : index
    %c0_83 = arith.constant 0 : index
    %103 = vector.load %arg6[%c19_82, %c0_83] : memref<40x32xf32, #tpu.memory_space<vmem>>, vector<1x32xf32>
    tpu.vector_store %arg6[%c19_82, %c0_83], %102 {strides = array<i32>} : memref<40x32xf32, #tpu.memory_space<vmem>>, vector<1x32xf32>,
    %c20 = arith.constant 20 : index
    %104 = memref.load %arg1[%c20] : memref<40xi32, #tpu.memory_space<smem>>
    %105 = arith.index_cast %104 : i32 to index
    %c0_84 = arith.constant 0 : index
    %106 = vector.load %arg2[%105, %c0_84] : memref<100x32xf32, #tpu.memory_space<vmem>>, vector<1x32xf32>
    %c20_85 = arith.constant 20 : index
    %c0_86 = arith.constant 0 : index
    %107 = vector.load %arg6[%c20_85, %c0_86] : memref<40x32xf32, #tpu.memory_space<vmem>>, vector<1x32xf32>
    tpu.vector_store %arg6[%c20_85, %c0_86], %106 {strides = array<i32>} : memref<40x32xf32, #tpu.memory_space<vmem>>, vector<1x32xf32>,
    %c21 = arith.constant 21 : index
    %108 = memref.load %arg1[%c21] : memref<40xi32, #tpu.memory_space<smem>>
    %109 = arith.index_cast %108 : i32 to index
    %c0_87 = arith.constant 0 : index
    %110 = vector.load %arg2[%109, %c0_87] : memref<100x32xf32, #tpu.memory_space<vmem>>, vector<1x32xf32>
    %c21_88 = arith.constant 21 : index
    %c0_89 = arith.constant 0 : index
    %111 = vector.load %arg6[%c21_88, %c0_89] : memref<40x32xf32, #tpu.memory_space<vmem>>, vector<1x32xf32>
    tpu.vector_store %arg6[%c21_88, %c0_89], %110 {strides = array<i32>} : memref<40x32xf32, #tpu.memory_space<vmem>>, vector<1x32xf32>,
    %c22 = arith.constant 22 : index
    %112 = memref.load %arg1[%c22] : memref<40xi32, #tpu.memory_space<smem>>
    %113 = arith.index_cast %112 : i32 to index
    %c0_90 = arith.constant 0 : index
    %114 = vector.load %arg2[%113, %c0_90] : memref<100x32xf32, #tpu.memory_space<vmem>>, vector<1x32xf32>
    %c22_91 = arith.constant 22 : index
    %c0_92 = arith.constant 0 : index
    %115 = vector.load %arg6[%c22_91, %c0_92] : memref<40x32xf32, #tpu.memory_space<vmem>>, vector<1x32xf32>
    tpu.vector_store %arg6[%c22_91, %c0_92], %114 {strides = array<i32>} : memref<40x32xf32, #tpu.memory_space<vmem>>, vector<1x32xf32>,
    %c23 = arith.constant 23 : index
    %116 = memref.load %arg1[%c23] : memref<40xi32, #tpu.memory_space<smem>>
    %117 = arith.index_cast %116 : i32 to index
    %c0_93 = arith.constant 0 : index
    %118 = vector.load %arg2[%117, %c0_93] : memref<100x32xf32, #tpu.memory_space<vmem>>, vector<1x32xf32>
    %c23_94 = arith.constant 23 : index
    %c0_95 = arith.constant 0 : index
    %119 = vector.load %arg6[%c23_94, %c0_95] : memref<40x32xf32, #tpu.memory_space<vmem>>, vector<1x32xf32>
    tpu.vector_store %arg6[%c23_94, %c0_95], %118 {strides = array<i32>} : memref<40x32xf32, #tpu.memory_space<vmem>>, vector<1x32xf32>,
    %c24 = arith.constant 24 : index
    %120 = memref.load %arg1[%c24] : memref<40xi32, #tpu.memory_space<smem>>
    %121 = arith.index_cast %120 : i32 to index
    %c0_96 = arith.constant 0 : index
    %122 = vector.load %arg2[%121, %c0_96] : memref<100x32xf32, #tpu.memory_space<vmem>>, vector<1x32xf32>
    %c24_97 = arith.constant 24 : index
    %c0_98 = arith.constant 0 : index
    %123 = vector.load %arg6[%c24_97, %c0_98] : memref<40x32xf32, #tpu.memory_space<vmem>>, vector<1x32xf32>
    tpu.vector_store %arg6[%c24_97, %c0_98], %122 {strides = array<i32>} : memref<40x32xf32, #tpu.memory_space<vmem>>, vector<1x32xf32>,
    %c25 = arith.constant 25 : index
    %124 = memref.load %arg1[%c25] : memref<40xi32, #tpu.memory_space<smem>>
    %125 = arith.index_cast %124 : i32 to index
    %c0_99 = arith.constant 0 : index
    %126 = vector.load %arg2[%125, %c0_99] : memref<100x32xf32, #tpu.memory_space<vmem>>, vector<1x32xf32>
    %c25_100 = arith.constant 25 : index
    %c0_101 = arith.constant 0 : index
    %127 = vector.load %arg6[%c25_100, %c0_101] : memref<40x32xf32, #tpu.memory_space<vmem>>, vector<1x32xf32>
    tpu.vector_store %arg6[%c25_100, %c0_101], %126 {strides = array<i32>} : memref<40x32xf32, #tpu.memory_space<vmem>>, vector<1x32xf32>,
    %c26 = arith.constant 26 : index
    %128 = memref.load %arg1[%c26] : memref<40xi32, #tpu.memory_space<smem>>
    %129 = arith.index_cast %128 : i32 to index
    %c0_102 = arith.constant 0 : index
    %130 = vector.load %arg2[%129, %c0_102] : memref<100x32xf32, #tpu.memory_space<vmem>>, vector<1x32xf32>
    %c26_103 = arith.constant 26 : index
    %c0_104 = arith.constant 0 : index
    %131 = vector.load %arg6[%c26_103, %c0_104] : memref<40x32xf32, #tpu.memory_space<vmem>>, vector<1x32xf32>
    tpu.vector_store %arg6[%c26_103, %c0_104], %130 {strides = array<i32>} : memref<40x32xf32, #tpu.memory_space<vmem>>, vector<1x32xf32>,
    %c27 = arith.constant 27 : index
    %132 = memref.load %arg1[%c27] : memref<40xi32, #tpu.memory_space<smem>>
    %133 = arith.index_cast %132 : i32 to index
    %c0_105 = arith.constant 0 : index
    %134 = vector.load %arg2[%133, %c0_105] : memref<100x32xf32, #tpu.memory_space<vmem>>, vector<1x32xf32>
    %c27_106 = arith.constant 27 : index
    %c0_107 = arith.constant 0 : index
    %135 = vector.load %arg6[%c27_106, %c0_107] : memref<40x32xf32, #tpu.memory_space<vmem>>, vector<1x32xf32>
    tpu.vector_store %arg6[%c27_106, %c0_107], %134 {strides = array<i32>} : memref<40x32xf32, #tpu.memory_space<vmem>>, vector<1x32xf32>,
    %c28 = arith.constant 28 : index
    %136 = memref.load %arg1[%c28] : memref<40xi32, #tpu.memory_space<smem>>
    %137 = arith.index_cast %136 : i32 to index
    %c0_108 = arith.constant 0 : index
    %138 = vector.load %arg2[%137, %c0_108] : memref<100x32xf32, #tpu.memory_space<vmem>>, vector<1x32xf32>
    %c28_109 = arith.constant 28 : index
    %c0_110 = arith.constant 0 : index
    %139 = vector.load %arg6[%c28_109, %c0_110] : memref<40x32xf32, #tpu.memory_space<vmem>>, vector<1x32xf32>
    tpu.vector_store %arg6[%c28_109, %c0_110], %138 {strides = array<i32>} : memref<40x32xf32, #tpu.memory_space<vmem>>, vector<1x32xf32>,
    %c29 = arith.constant 29 : index
    %140 = memref.load %arg1[%c29] : memref<40xi32, #tpu.memory_space<smem>>
    %141 = arith.index_cast %140 : i32 to index
    %c0_111 = arith.constant 0 : index
    %142 = vector.load %arg2[%141, %c0_111] : memref<100x32xf32, #tpu.memory_space<vmem>>, vector<1x32xf32>
    %c29_112 = arith.constant 29 : index
    %c0_113 = arith.constant 0 : index
    %143 = vector.load %arg6[%c29_112, %c0_113] : memref<40x32xf32, #tpu.memory_space<vmem>>, vector<1x32xf32>
    tpu.vector_store %arg6[%c29_112, %c0_113], %142 {strides = array<i32>} : memref<40x32xf32, #tpu.memory_space<vmem>>, vector<1x32xf32>,
    %c30 = arith.constant 30 : index
    %144 = memref.load %arg1[%c30] : memref<40xi32, #tpu.memory_space<smem>>
    %145 = arith.index_cast %144 : i32 to index
    %c0_114 = arith.constant 0 : index
    %146 = vector.load %arg2[%145, %c0_114] : memref<100x32xf32, #tpu.memory_space<vmem>>, vector<1x32xf32>
    %c30_115 = arith.constant 30 : index
    %c0_116 = arith.constant 0 : index
    %147 = vector.load %arg6[%c30_115, %c0_116] : memref<40x32xf32, #tpu.memory_space<vmem>>, vector<1x32xf32>
    tpu.vector_store %arg6[%c30_115, %c0_116], %146 {strides = array<i32>} : memref<40x32xf32, #tpu.memory_space<vmem>>, vector<1x32xf32>,
    %c31 = arith.constant 31 : index
    %148 = memref.load %arg1[%c31] : memref<40xi32, #tpu.memory_space<smem>>
    %149 = arith.index_cast %148 : i32 to index
    %c0_117 = arith.constant 0 : index
    %150 = vector.load %arg2[%149, %c0_117] : memref<100x32xf32, #tpu.memory_space<vmem>>, vector<1x32xf32>
    %c31_118 = arith.constant 31 : index
    %c0_119 = arith.constant 0 : index
    %151 = vector.load %arg6[%c31_118, %c0_119] : memref<40x32xf32, #tpu.memory_space<vmem>>, vector<1x32xf32>
    tpu.vector_store %arg6[%c31_118, %c0_119], %150 {strides = array<i32>} : memref<40x32xf32, #tpu.memory_space<vmem>>, vector<1x32xf32>,
    %c32 = arith.constant 32 : index
    %152 = memref.load %arg1[%c32] : memref<40xi32, #tpu.memory_space<smem>>
    %153 = arith.index_cast %152 : i32 to index
    %c0_120 = arith.constant 0 : index
    %154 = vector.load %arg2[%153, %c0_120] : memref<100x32xf32, #tpu.memory_space<vmem>>, vector<1x32xf32>
    %c32_121 = arith.constant 32 : index
    %c0_122 = arith.constant 0 : index
    %155 = vector.load %arg6[%c32_121, %c0_122] : memref<40x32xf32, #tpu.memory_space<vmem>>, vector<1x32xf32>
    tpu.vector_store %arg6[%c32_121, %c0_122], %154 {strides = array<i32>} : memref<40x32xf32, #tpu.memory_space<vmem>>, vector<1x32xf32>,
    %c33 = arith.constant 33 : index
    %156 = memref.load %arg1[%c33] : memref<40xi32, #tpu.memory_space<smem>>
    %157 = arith.index_cast %156 : i32 to index
    %c0_123 = arith.constant 0 : index
    %158 = vector.load %arg2[%157, %c0_123] : memref<100x32xf32, #tpu.memory_space<vmem>>, vector<1x32xf32>
    %c33_124 = arith.constant 33 : index
    %c0_125 = arith.constant 0 : index
    %159 = vector.load %arg6[%c33_124, %c0_125] : memref<40x32xf32, #tpu.memory_space<vmem>>, vector<1x32xf32>
    tpu.vector_store %arg6[%c33_124, %c0_125], %158 {strides = array<i32>} : memref<40x32xf32, #tpu.memory_space<vmem>>, vector<1x32xf32>,
    %c34 = arith.constant 34 : index
    %160 = memref.load %arg1[%c34] : memref<40xi32, #tpu.memory_space<smem>>
    %161 = arith.index_cast %160 : i32 to index
    %c0_126 = arith.constant 0 : index
    %162 = vector.load %arg2[%161, %c0_126] : memref<100x32xf32, #tpu.memory_space<vmem>>, vector<1x32xf32>
    %c34_127 = arith.constant 34 : index
    %c0_128 = arith.constant 0 : index
    %163 = vector.load %arg6[%c34_127, %c0_128] : memref<40x32xf32, #tpu.memory_space<vmem>>, vector<1x32xf32>
    tpu.vector_store %arg6[%c34_127, %c0_128], %162 {strides = array<i32>} : memref<40x32xf32, #tpu.memory_space<vmem>>, vector<1x32xf32>,
    %c35 = arith.constant 35 : index
    %164 = memref.load %arg1[%c35] : memref<40xi32, #tpu.memory_space<smem>>
    %165 = arith.index_cast %164 : i32 to index
    %c0_129 = arith.constant 0 : index
    %166 = vector.load %arg2[%165, %c0_129] : memref<100x32xf32, #tpu.memory_space<vmem>>, vector<1x32xf32>
    %c35_130 = arith.constant 35 : index
    %c0_131 = arith.constant 0 : index
    %167 = vector.load %arg6[%c35_130, %c0_131] : memref<40x32xf32, #tpu.memory_space<vmem>>, vector<1x32xf32>
    tpu.vector_store %arg6[%c35_130, %c0_131], %166 {strides = array<i32>} : memref<40x32xf32, #tpu.memory_space<vmem>>, vector<1x32xf32>,
    %c36 = arith.constant 36 : index
    %168 = memref.load %arg1[%c36] : memref<40xi32, #tpu.memory_space<smem>>
    %169 = arith.index_cast %168 : i32 to index
    %c0_132 = arith.constant 0 : index
    %170 = vector.load %arg2[%169, %c0_132] : memref<100x32xf32, #tpu.memory_space<vmem>>, vector<1x32xf32>
    %c36_133 = arith.constant 36 : index
    %c0_134 = arith.constant 0 : index
    %171 = vector.load %arg6[%c36_133, %c0_134] : memref<40x32xf32, #tpu.memory_space<vmem>>, vector<1x32xf32>
    tpu.vector_store %arg6[%c36_133, %c0_134], %170 {strides = array<i32>} : memref<40x32xf32, #tpu.memory_space<vmem>>, vector<1x32xf32>,
    %c37 = arith.constant 37 : index
    %172 = memref.load %arg1[%c37] : memref<40xi32, #tpu.memory_space<smem>>
    %173 = arith.index_cast %172 : i32 to index
    %c0_135 = arith.constant 0 : index
    %174 = vector.load %arg2[%173, %c0_135] : memref<100x32xf32, #tpu.memory_space<vmem>>, vector<1x32xf32>
    %c37_136 = arith.constant 37 : index
    %c0_137 = arith.constant 0 : index
    %175 = vector.load %arg6[%c37_136, %c0_137] : memref<40x32xf32, #tpu.memory_space<vmem>>, vector<1x32xf32>
    tpu.vector_store %arg6[%c37_136, %c0_137], %174 {strides = array<i32>} : memref<40x32xf32, #tpu.memory_space<vmem>>, vector<1x32xf32>,
    %c38 = arith.constant 38 : index
    %176 = memref.load %arg1[%c38] : memref<40xi32, #tpu.memory_space<smem>>
    %177 = arith.index_cast %176 : i32 to index
    %c0_138 = arith.constant 0 : index
    %178 = vector.load %arg2[%177, %c0_138] : memref<100x32xf32, #tpu.memory_space<vmem>>, vector<1x32xf32>
    %c38_139 = arith.constant 38 : index
    %c0_140 = arith.constant 0 : index
    %179 = vector.load %arg6[%c38_139, %c0_140] : memref<40x32xf32, #tpu.memory_space<vmem>>, vector<1x32xf32>
    tpu.vector_store %arg6[%c38_139, %c0_140], %178 {strides = array<i32>} : memref<40x32xf32, #tpu.memory_space<vmem>>, vector<1x32xf32>,
    %c39 = arith.constant 39 : index
    %180 = memref.load %arg1[%c39] : memref<40xi32, #tpu.memory_space<smem>>
    %181 = arith.index_cast %180 : i32 to index
    %c0_141 = arith.constant 0 : index
    %182 = vector.load %arg2[%181, %c0_141] : memref<100x32xf32, #tpu.memory_space<vmem>>, vector<1x32xf32>
    %c39_142 = arith.constant 39 : index
    %c0_143 = arith.constant 0 : index
    %183 = vector.load %arg6[%c39_142, %c0_143] : memref<40x32xf32, #tpu.memory_space<vmem>>, vector<1x32xf32>
    tpu.vector_store %arg6[%c39_142, %c0_143], %182 {strides = array<i32>} : memref<40x32xf32, #tpu.memory_space<vmem>>, vector<1x32xf32>,
    %c0_144 = arith.constant 0 : index
    %c0_145 = arith.constant 0 : index
    %184 = vector.load %arg5[%c0_144, %c0_145] : memref<6x32xf32, #tpu.memory_space<vmem>>, vector<6x32xf32>
    %c0_146 = arith.constant 0 : index
    %c0_147 = arith.constant 0 : index
    %185 = vector.load %arg3[%c0_146, %c0_147] : memref<208x128xf32, #tpu.memory_space<vmem>>, vector<32x128xf32>
    %186 = arith.truncf %185 : vector<32x128xf32> to vector<32x128xbf16>
    %c200 = arith.constant 200 : index
    %c0_148 = arith.constant 0 : index
    %187 = vector.load %arg3[%c200, %c0_148] : memref<208x128xf32, #tpu.memory_space<vmem>>, vector<1x128xf32>
    %c201 = arith.constant 201 : index
    %c0_149 = arith.constant 0 : index
    %188 = vector.load %arg3[%c201, %c0_149] : memref<208x128xf32, #tpu.memory_space<vmem>>, vector<1x128xf32>
    %189 = arith.truncf %184 : vector<6x32xf32> to vector<6x32xbf16>
    %cst = arith.constant dense<0.000000e+00> : vector<6x128xf32>
    %190 = tpu.matmul %189, %186, %cst {dimension_numbers = #tpu.dot_dimension_numbers<[1], [0], [0], [1], [0, 0, 1, 1], [], []>} : vector<6x32xbf16>, vector<32x128xbf16>, vector<6x128xf32> -> vector<6x128xf32>
    %191 = vector.broadcast %187 : vector<1x128xf32> to vector<6x128xf32>
    %192 = arith.addf %190, %191 : vector<6x128xf32>
    %c32_150 = arith.constant 32 : index
    %c0_151 = arith.constant 0 : index
    %193 = vector.load %arg3[%c32_150, %c0_151] : memref<208x128xf32, #tpu.memory_space<vmem>>, vector<32x128xf32>
    %194 = arith.truncf %193 : vector<32x128xf32> to vector<32x128xbf16>
    %195 = vector.extract_strided_slice %192 {offsets = [0, 0], sizes = [1, 128], strides = [1, 1]} : vector<6x128xf32> to vector<1x128xf32>
    %196 = vector.extract_strided_slice %195 {offsets = [0, 0], sizes = [1, 64], strides = [1, 1]} : vector<1x128xf32> to vector<1x64xf32>
    %197 = vector.extract_strided_slice %188 {offsets = [0, 0], sizes = [1, 64], strides = [1, 1]} : vector<1x128xf32> to vector<1x64xf32>
    %198 = arith.addf %196, %197 : vector<1x64xf32>
    %199 = arith.negf %198 : vector<1x64xf32>
    %200 = math.exp %199 : vector<1x64xf32>
    %cst_152 = arith.constant 1.000000e+00 : f32
    %201 = vector.broadcast %cst_152 : f32 to vector<1x64xf32>
    %202 = arith.addf %201, %200 : vector<1x64xf32>
    %203 = arith.divf %201, %202 : vector<1x64xf32>
    %204 = vector.extract_strided_slice %203 {offsets = [0, 0], sizes = [1, 32], strides = [1, 1]} : vector<1x64xf32> to vector<1x32xf32>
    %205 = vector.extract_strided_slice %203 {offsets = [0, 32], sizes = [1, 32], strides = [1, 1]} : vector<1x64xf32> to vector<1x32xf32>
    %206 = vector.extract_strided_slice %195 {offsets = [0, 64], sizes = [1, 32], strides = [1, 1]} : vector<1x128xf32> to vector<1x32xf32>
    %207 = vector.extract_strided_slice %188 {offsets = [0, 64], sizes = [1, 32], strides = [1, 1]} : vector<1x128xf32> to vector<1x32xf32>
    %208 = arith.mulf %204, %207 : vector<1x32xf32>
    %209 = arith.addf %206, %208 : vector<1x32xf32>
    %210 = math.tanh %209 : vector<1x32xf32>
    %cst_153 = arith.constant 1.000000e+00 : f32
    %211 = vector.broadcast %cst_153 : f32 to vector<1x32xf32>
    %212 = arith.subf %211, %205 : vector<1x32xf32>
    %213 = arith.mulf %212, %210 : vector<1x32xf32>
    %214 = vector.extract_strided_slice %192 {offsets = [1, 0], sizes = [1, 128], strides = [1, 1]} : vector<6x128xf32> to vector<1x128xf32>
    %215 = arith.truncf %213 : vector<1x32xf32> to vector<1x32xbf16>
    %cst_154 = arith.constant dense<0.000000e+00> : vector<1x128xf32>
    %216 = tpu.matmul %215, %194, %cst_154 {dimension_numbers = #tpu.dot_dimension_numbers<[1], [0], [0], [1], [0, 0, 1, 1], [], []>} : vector<1x32xbf16>, vector<32x128xbf16>, vector<1x128xf32> -> vector<1x128xf32>
    %217 = arith.addf %216, %188 : vector<1x128xf32>
    %218 = vector.extract_strided_slice %214 {offsets = [0, 0], sizes = [1, 64], strides = [1, 1]} : vector<1x128xf32> to vector<1x64xf32>
    %219 = vector.extract_strided_slice %217 {offsets = [0, 0], sizes = [1, 64], strides = [1, 1]} : vector<1x128xf32> to vector<1x64xf32>
    %220 = arith.addf %218, %219 : vector<1x64xf32>
    %221 = arith.negf %220 : vector<1x64xf32>
    %222 = math.exp %221 : vector<1x64xf32>
    %cst_155 = arith.constant 1.000000e+00 : f32
    %223 = vector.broadcast %cst_155 : f32 to vector<1x64xf32>
    %224 = arith.addf %223, %222 : vector<1x64xf32>
    %225 = arith.divf %223, %224 : vector<1x64xf32>
    %226 = vector.extract_strided_slice %225 {offsets = [0, 0], sizes = [1, 32], strides = [1, 1]} : vector<1x64xf32> to vector<1x32xf32>
    %227 = vector.extract_strided_slice %225 {offsets = [0, 32], sizes = [1, 32], strides = [1, 1]} : vector<1x64xf32> to vector<1x32xf32>
    %228 = vector.extract_strided_slice %214 {offsets = [0, 64], sizes = [1, 32], strides = [1, 1]} : vector<1x128xf32> to vector<1x32xf32>
    %229 = vector.extract_strided_slice %217 {offsets = [0, 64], sizes = [1, 32], strides = [1, 1]} : vector<1x128xf32> to vector<1x32xf32>
    %230 = arith.mulf %226, %229 : vector<1x32xf32>
    %231 = arith.addf %228, %230 : vector<1x32xf32>
    %232 = math.tanh %231 : vector<1x32xf32>
    %cst_156 = arith.constant 1.000000e+00 : f32
    %233 = vector.broadcast %cst_156 : f32 to vector<1x32xf32>
    %234 = arith.subf %233, %227 : vector<1x32xf32>
    %235 = arith.mulf %234, %232 : vector<1x32xf32>
    %236 = arith.mulf %227, %213 : vector<1x32xf32>
    %237 = arith.addf %235, %236 : vector<1x32xf32>
    %238 = vector.extract_strided_slice %192 {offsets = [2, 0], sizes = [1, 128], strides = [1, 1]} : vector<6x128xf32> to vector<1x128xf32>
    %239 = arith.truncf %237 : vector<1x32xf32> to vector<1x32xbf16>
    %cst_157 = arith.constant dense<0.000000e+00> : vector<1x128xf32>
    %240 = tpu.matmul %239, %194, %cst_157 {dimension_numbers = #tpu.dot_dimension_numbers<[1], [0], [0], [1], [0, 0, 1, 1], [], []>} : vector<1x32xbf16>, vector<32x128xbf16>, vector<1x128xf32> -> vector<1x128xf32>
    %241 = arith.addf %240, %188 : vector<1x128xf32>
    %242 = vector.extract_strided_slice %238 {offsets = [0, 0], sizes = [1, 64], strides = [1, 1]} : vector<1x128xf32> to vector<1x64xf32>
    %243 = vector.extract_strided_slice %241 {offsets = [0, 0], sizes = [1, 64], strides = [1, 1]} : vector<1x128xf32> to vector<1x64xf32>
    %244 = arith.addf %242, %243 : vector<1x64xf32>
    %245 = arith.negf %244 : vector<1x64xf32>
    %246 = math.exp %245 : vector<1x64xf32>
    %cst_158 = arith.constant 1.000000e+00 : f32
    %247 = vector.broadcast %cst_158 : f32 to vector<1x64xf32>
    %248 = arith.addf %247, %246 : vector<1x64xf32>
    %249 = arith.divf %247, %248 : vector<1x64xf32>
    %250 = vector.extract_strided_slice %249 {offsets = [0, 0], sizes = [1, 32], strides = [1, 1]} : vector<1x64xf32> to vector<1x32xf32>
    %251 = vector.extract_strided_slice %249 {offsets = [0, 32], sizes = [1, 32], strides = [1, 1]} : vector<1x64xf32> to vector<1x32xf32>
    %252 = vector.extract_strided_slice %238 {offsets = [0, 64], sizes = [1, 32], strides = [1, 1]} : vector<1x128xf32> to vector<1x32xf32>
    %253 = vector.extract_strided_slice %241 {offsets = [0, 64], sizes = [1, 32], strides = [1, 1]} : vector<1x128xf32> to vector<1x32xf32>
    %254 = arith.mulf %250, %253 : vector<1x32xf32>
    %255 = arith.addf %252, %254 : vector<1x32xf32>
    %256 = math.tanh %255 : vector<1x32xf32>
    %cst_159 = arith.constant 1.000000e+00 : f32
    %257 = vector.broadcast %cst_159 : f32 to vector<1x32xf32>
    %258 = arith.subf %257, %251 : vector<1x32xf32>
    %259 = arith.mulf %258, %256 : vector<1x32xf32>
    %260 = arith.mulf %251, %237 : vector<1x32xf32>
    %261 = arith.addf %259, %260 : vector<1x32xf32>
    %262 = vector.extract_strided_slice %192 {offsets = [3, 0], sizes = [1, 128], strides = [1, 1]} : vector<6x128xf32> to vector<1x128xf32>
    %263 = arith.truncf %261 : vector<1x32xf32> to vector<1x32xbf16>
    %cst_160 = arith.constant dense<0.000000e+00> : vector<1x128xf32>
    %264 = tpu.matmul %263, %194, %cst_160 {dimension_numbers = #tpu.dot_dimension_numbers<[1], [0], [0], [1], [0, 0, 1, 1], [], []>} : vector<1x32xbf16>, vector<32x128xbf16>, vector<1x128xf32> -> vector<1x128xf32>
    %265 = arith.addf %264, %188 : vector<1x128xf32>
    %266 = vector.extract_strided_slice %262 {offsets = [0, 0], sizes = [1, 64], strides = [1, 1]} : vector<1x128xf32> to vector<1x64xf32>
    %267 = vector.extract_strided_slice %265 {offsets = [0, 0], sizes = [1, 64], strides = [1, 1]} : vector<1x128xf32> to vector<1x64xf32>
    %268 = arith.addf %266, %267 : vector<1x64xf32>
    %269 = arith.negf %268 : vector<1x64xf32>
    %270 = math.exp %269 : vector<1x64xf32>
    %cst_161 = arith.constant 1.000000e+00 : f32
    %271 = vector.broadcast %cst_161 : f32 to vector<1x64xf32>
    %272 = arith.addf %271, %270 : vector<1x64xf32>
    %273 = arith.divf %271, %272 : vector<1x64xf32>
    %274 = vector.extract_strided_slice %273 {offsets = [0, 0], sizes = [1, 32], strides = [1, 1]} : vector<1x64xf32> to vector<1x32xf32>
    %275 = vector.extract_strided_slice %273 {offsets = [0, 32], sizes = [1, 32], strides = [1, 1]} : vector<1x64xf32> to vector<1x32xf32>
    %276 = vector.extract_strided_slice %262 {offsets = [0, 64], sizes = [1, 32], strides = [1, 1]} : vector<1x128xf32> to vector<1x32xf32>
    %277 = vector.extract_strided_slice %265 {offsets = [0, 64], sizes = [1, 32], strides = [1, 1]} : vector<1x128xf32> to vector<1x32xf32>
    %278 = arith.mulf %274, %277 : vector<1x32xf32>
    %279 = arith.addf %276, %278 : vector<1x32xf32>
    %280 = math.tanh %279 : vector<1x32xf32>
    %cst_162 = arith.constant 1.000000e+00 : f32
    %281 = vector.broadcast %cst_162 : f32 to vector<1x32xf32>
    %282 = arith.subf %281, %275 : vector<1x32xf32>
    %283 = arith.mulf %282, %280 : vector<1x32xf32>
    %284 = arith.mulf %275, %261 : vector<1x32xf32>
    %285 = arith.addf %283, %284 : vector<1x32xf32>
    %286 = vector.extract_strided_slice %192 {offsets = [4, 0], sizes = [1, 128], strides = [1, 1]} : vector<6x128xf32> to vector<1x128xf32>
    %287 = arith.truncf %285 : vector<1x32xf32> to vector<1x32xbf16>
    %cst_163 = arith.constant dense<0.000000e+00> : vector<1x128xf32>
    %288 = tpu.matmul %287, %194, %cst_163 {dimension_numbers = #tpu.dot_dimension_numbers<[1], [0], [0], [1], [0, 0, 1, 1], [], []>} : vector<1x32xbf16>, vector<32x128xbf16>, vector<1x128xf32> -> vector<1x128xf32>
    %289 = arith.addf %288, %188 : vector<1x128xf32>
    %290 = vector.extract_strided_slice %286 {offsets = [0, 0], sizes = [1, 64], strides = [1, 1]} : vector<1x128xf32> to vector<1x64xf32>
    %291 = vector.extract_strided_slice %289 {offsets = [0, 0], sizes = [1, 64], strides = [1, 1]} : vector<1x128xf32> to vector<1x64xf32>
    %292 = arith.addf %290, %291 : vector<1x64xf32>
    %293 = arith.negf %292 : vector<1x64xf32>
    %294 = math.exp %293 : vector<1x64xf32>
    %cst_164 = arith.constant 1.000000e+00 : f32
    %295 = vector.broadcast %cst_164 : f32 to vector<1x64xf32>
    %296 = arith.addf %295, %294 : vector<1x64xf32>
    %297 = arith.divf %295, %296 : vector<1x64xf32>
    %298 = vector.extract_strided_slice %297 {offsets = [0, 0], sizes = [1, 32], strides = [1, 1]} : vector<1x64xf32> to vector<1x32xf32>
    %299 = vector.extract_strided_slice %297 {offsets = [0, 32], sizes = [1, 32], strides = [1, 1]} : vector<1x64xf32> to vector<1x32xf32>
    %300 = vector.extract_strided_slice %286 {offsets = [0, 64], sizes = [1, 32], strides = [1, 1]} : vector<1x128xf32> to vector<1x32xf32>
    %301 = vector.extract_strided_slice %289 {offsets = [0, 64], sizes = [1, 32], strides = [1, 1]} : vector<1x128xf32> to vector<1x32xf32>
    %302 = arith.mulf %298, %301 : vector<1x32xf32>
    %303 = arith.addf %300, %302 : vector<1x32xf32>
    %304 = math.tanh %303 : vector<1x32xf32>
    %cst_165 = arith.constant 1.000000e+00 : f32
    %305 = vector.broadcast %cst_165 : f32 to vector<1x32xf32>
    %306 = arith.subf %305, %299 : vector<1x32xf32>
    %307 = arith.mulf %306, %304 : vector<1x32xf32>
    %308 = arith.mulf %299, %285 : vector<1x32xf32>
    %309 = arith.addf %307, %308 : vector<1x32xf32>
    %310 = vector.extract_strided_slice %192 {offsets = [5, 0], sizes = [1, 128], strides = [1, 1]} : vector<6x128xf32> to vector<1x128xf32>
    %311 = arith.truncf %309 : vector<1x32xf32> to vector<1x32xbf16>
    %cst_166 = arith.constant dense<0.000000e+00> : vector<1x128xf32>
    %312 = tpu.matmul %311, %194, %cst_166 {dimension_numbers = #tpu.dot_dimension_numbers<[1], [0], [0], [1], [0, 0, 1, 1], [], []>} : vector<1x32xbf16>, vector<32x128xbf16>, vector<1x128xf32> -> vector<1x128xf32>
    %313 = arith.addf %312, %188 : vector<1x128xf32>
    %314 = vector.extract_strided_slice %310 {offsets = [0, 0], sizes = [1, 64], strides = [1, 1]} : vector<1x128xf32> to vector<1x64xf32>
    %315 = vector.extract_strided_slice %313 {offsets = [0, 0], sizes = [1, 64], strides = [1, 1]} : vector<1x128xf32> to vector<1x64xf32>
    %316 = arith.addf %314, %315 : vector<1x64xf32>
    %317 = arith.negf %316 : vector<1x64xf32>
    %318 = math.exp %317 : vector<1x64xf32>
    %cst_167 = arith.constant 1.000000e+00 : f32
    %319 = vector.broadcast %cst_167 : f32 to vector<1x64xf32>
    %320 = arith.addf %319, %318 : vector<1x64xf32>
    %321 = arith.divf %319, %320 : vector<1x64xf32>
    %322 = vector.extract_strided_slice %321 {offsets = [0, 0], sizes = [1, 32], strides = [1, 1]} : vector<1x64xf32> to vector<1x32xf32>
    %323 = vector.extract_strided_slice %321 {offsets = [0, 32], sizes = [1, 32], strides = [1, 1]} : vector<1x64xf32> to vector<1x32xf32>
    %324 = vector.extract_strided_slice %310 {offsets = [0, 64], sizes = [1, 32], strides = [1, 1]} : vector<1x128xf32> to vector<1x32xf32>
    %325 = vector.extract_strided_slice %313 {offsets = [0, 64], sizes = [1, 32], strides = [1, 1]} : vector<1x128xf32> to vector<1x32xf32>
    %326 = arith.mulf %322, %325 : vector<1x32xf32>
    %327 = arith.addf %324, %326 : vector<1x32xf32>
    %328 = math.tanh %327 : vector<1x32xf32>
    %cst_168 = arith.constant 1.000000e+00 : f32
    %329 = vector.broadcast %cst_168 : f32 to vector<1x32xf32>
    %330 = arith.subf %329, %323 : vector<1x32xf32>
    %331 = arith.mulf %330, %328 : vector<1x32xf32>
    %332 = arith.mulf %323, %309 : vector<1x32xf32>
    %333 = arith.addf %331, %332 : vector<1x32xf32>
    %c0_169 = arith.constant 0 : index
    %c0_170 = arith.constant 0 : index
    %334 = vector.load %arg6[%c0_169, %c0_170] : memref<40x32xf32, #tpu.memory_space<vmem>>, vector<40x32xf32>
    %c64 = arith.constant 64 : index
    %c0_171 = arith.constant 0 : index
    %335 = vector.load %arg3[%c64, %c0_171] : memref<208x128xf32, #tpu.memory_space<vmem>>, vector<32x128xf32>
    %336 = arith.truncf %335 : vector<32x128xf32> to vector<32x128xbf16>
    %c202 = arith.constant 202 : index
    %c0_172 = arith.constant 0 : index
    %337 = vector.load %arg3[%c202, %c0_172] : memref<208x128xf32, #tpu.memory_space<vmem>>, vector<1x128xf32>
    %c203 = arith.constant 203 : index
    %c0_173 = arith.constant 0 : index
    %338 = vector.load %arg3[%c203, %c0_173] : memref<208x128xf32, #tpu.memory_space<vmem>>, vector<1x128xf32>
    %339 = arith.truncf %334 : vector<40x32xf32> to vector<40x32xbf16>
    %cst_174 = arith.constant dense<0.000000e+00> : vector<40x128xf32>
    %340 = tpu.matmul %339, %336, %cst_174 {dimension_numbers = #tpu.dot_dimension_numbers<[1], [0], [0], [1], [0, 0, 1, 1], [], []>} : vector<40x32xbf16>, vector<32x128xbf16>, vector<40x128xf32> -> vector<40x128xf32>
    %341 = vector.broadcast %337 : vector<1x128xf32> to vector<40x128xf32>
    %342 = arith.addf %340, %341 : vector<40x128xf32>
    %c96 = arith.constant 96 : index
    %c0_175 = arith.constant 0 : index
    %343 = vector.load %arg3[%c96, %c0_175] : memref<208x128xf32, #tpu.memory_space<vmem>>, vector<32x128xf32>
    %344 = arith.truncf %343 : vector<32x128xf32> to vector<32x128xbf16>
    %345 = vector.extract_strided_slice %342 {offsets = [0, 0], sizes = [8, 128], strides = [1, 1]} : vector<40x128xf32> to vector<8x128xf32>
    %346 = vector.extract_strided_slice %345 {offsets = [0, 0], sizes = [8, 64], strides = [1, 1]} : vector<8x128xf32> to vector<8x64xf32>
    %347 = vector.extract_strided_slice %338 {offsets = [0, 0], sizes = [1, 64], strides = [1, 1]} : vector<1x128xf32> to vector<1x64xf32>
    %348 = vector.broadcast %347 : vector<1x64xf32> to vector<8x64xf32>
    %349 = arith.addf %346, %348 : vector<8x64xf32>
    %350 = arith.negf %349 : vector<8x64xf32>
    %351 = math.exp %350 : vector<8x64xf32>
    %cst_176 = arith.constant 1.000000e+00 : f32
    %352 = vector.broadcast %cst_176 : f32 to vector<8x64xf32>
    %353 = arith.addf %352, %351 : vector<8x64xf32>
    %354 = arith.divf %352, %353 : vector<8x64xf32>
    %355 = vector.extract_strided_slice %354 {offsets = [0, 0], sizes = [8, 32], strides = [1, 1]} : vector<8x64xf32> to vector<8x32xf32>
    %356 = vector.extract_strided_slice %354 {offsets = [0, 32], sizes = [8, 32], strides = [1, 1]} : vector<8x64xf32> to vector<8x32xf32>
    %357 = vector.extract_strided_slice %345 {offsets = [0, 64], sizes = [8, 32], strides = [1, 1]} : vector<8x128xf32> to vector<8x32xf32>
    %358 = vector.extract_strided_slice %338 {offsets = [0, 64], sizes = [1, 32], strides = [1, 1]} : vector<1x128xf32> to vector<1x32xf32>
    %359 = vector.broadcast %358 : vector<1x32xf32> to vector<8x32xf32>
    %360 = arith.mulf %355, %359 : vector<8x32xf32>
    %361 = arith.addf %357, %360 : vector<8x32xf32>
    %362 = math.tanh %361 : vector<8x32xf32>
    %cst_177 = arith.constant 1.000000e+00 : f32
    %363 = vector.broadcast %cst_177 : f32 to vector<8x32xf32>
    %364 = arith.subf %363, %356 : vector<8x32xf32>
    %365 = arith.mulf %364, %362 : vector<8x32xf32>
    %366 = vector.extract_strided_slice %342 {offsets = [8, 0], sizes = [8, 128], strides = [1, 1]} : vector<40x128xf32> to vector<8x128xf32>
    %367 = arith.truncf %365 : vector<8x32xf32> to vector<8x32xbf16>
    %cst_178 = arith.constant dense<0.000000e+00> : vector<8x128xf32>
    %368 = tpu.matmul %367, %344, %cst_178 {dimension_numbers = #tpu.dot_dimension_numbers<[1], [0], [0], [1], [0, 0, 1, 1], [], []>} : vector<8x32xbf16>, vector<32x128xbf16>, vector<8x128xf32> -> vector<8x128xf32>
    %369 = vector.broadcast %338 : vector<1x128xf32> to vector<8x128xf32>
    %370 = arith.addf %368, %369 : vector<8x128xf32>
    %371 = vector.extract_strided_slice %366 {offsets = [0, 0], sizes = [8, 64], strides = [1, 1]} : vector<8x128xf32> to vector<8x64xf32>
    %372 = vector.extract_strided_slice %370 {offsets = [0, 0], sizes = [8, 64], strides = [1, 1]} : vector<8x128xf32> to vector<8x64xf32>
    %373 = arith.addf %371, %372 : vector<8x64xf32>
    %374 = arith.negf %373 : vector<8x64xf32>
    %375 = math.exp %374 : vector<8x64xf32>
    %cst_179 = arith.constant 1.000000e+00 : f32
    %376 = vector.broadcast %cst_179 : f32 to vector<8x64xf32>
    %377 = arith.addf %376, %375 : vector<8x64xf32>
    %378 = arith.divf %376, %377 : vector<8x64xf32>
    %379 = vector.extract_strided_slice %378 {offsets = [0, 0], sizes = [8, 32], strides = [1, 1]} : vector<8x64xf32> to vector<8x32xf32>
    %380 = vector.extract_strided_slice %378 {offsets = [0, 32], sizes = [8, 32], strides = [1, 1]} : vector<8x64xf32> to vector<8x32xf32>
    %381 = vector.extract_strided_slice %366 {offsets = [0, 64], sizes = [8, 32], strides = [1, 1]} : vector<8x128xf32> to vector<8x32xf32>
    %382 = vector.extract_strided_slice %370 {offsets = [0, 64], sizes = [8, 32], strides = [1, 1]} : vector<8x128xf32> to vector<8x32xf32>
    %383 = arith.mulf %379, %382 : vector<8x32xf32>
    %384 = arith.addf %381, %383 : vector<8x32xf32>
    %385 = math.tanh %384 : vector<8x32xf32>
    %cst_180 = arith.constant 1.000000e+00 : f32
    %386 = vector.broadcast %cst_180 : f32 to vector<8x32xf32>
    %387 = arith.subf %386, %380 : vector<8x32xf32>
    %388 = arith.mulf %387, %385 : vector<8x32xf32>
    %389 = arith.mulf %380, %365 : vector<8x32xf32>
    %390 = arith.addf %388, %389 : vector<8x32xf32>
    %391 = vector.extract_strided_slice %342 {offsets = [16, 0], sizes = [8, 128], strides = [1, 1]} : vector<40x128xf32> to vector<8x128xf32>
    %392 = arith.truncf %390 : vector<8x32xf32> to vector<8x32xbf16>
    %cst_181 = arith.constant dense<0.000000e+00> : vector<8x128xf32>
    %393 = tpu.matmul %392, %344, %cst_181 {dimension_numbers = #tpu.dot_dimension_numbers<[1], [0], [0], [1], [0, 0, 1, 1], [], []>} : vector<8x32xbf16>, vector<32x128xbf16>, vector<8x128xf32> -> vector<8x128xf32>
    %394 = vector.broadcast %338 : vector<1x128xf32> to vector<8x128xf32>
    %395 = arith.addf %393, %394 : vector<8x128xf32>
    %396 = vector.extract_strided_slice %391 {offsets = [0, 0], sizes = [8, 64], strides = [1, 1]} : vector<8x128xf32> to vector<8x64xf32>
    %397 = vector.extract_strided_slice %395 {offsets = [0, 0], sizes = [8, 64], strides = [1, 1]} : vector<8x128xf32> to vector<8x64xf32>
    %398 = arith.addf %396, %397 : vector<8x64xf32>
    %399 = arith.negf %398 : vector<8x64xf32>
    %400 = math.exp %399 : vector<8x64xf32>
    %cst_182 = arith.constant 1.000000e+00 : f32
    %401 = vector.broadcast %cst_182 : f32 to vector<8x64xf32>
    %402 = arith.addf %401, %400 : vector<8x64xf32>
    %403 = arith.divf %401, %402 : vector<8x64xf32>
    %404 = vector.extract_strided_slice %403 {offsets = [0, 0], sizes = [8, 32], strides = [1, 1]} : vector<8x64xf32> to vector<8x32xf32>
    %405 = vector.extract_strided_slice %403 {offsets = [0, 32], sizes = [8, 32], strides = [1, 1]} : vector<8x64xf32> to vector<8x32xf32>
    %406 = vector.extract_strided_slice %391 {offsets = [0, 64], sizes = [8, 32], strides = [1, 1]} : vector<8x128xf32> to vector<8x32xf32>
    %407 = vector.extract_strided_slice %395 {offsets = [0, 64], sizes = [8, 32], strides = [1, 1]} : vector<8x128xf32> to vector<8x32xf32>
    %408 = arith.mulf %404, %407 : vector<8x32xf32>
    %409 = arith.addf %406, %408 : vector<8x32xf32>
    %410 = math.tanh %409 : vector<8x32xf32>
    %cst_183 = arith.constant 1.000000e+00 : f32
    %411 = vector.broadcast %cst_183 : f32 to vector<8x32xf32>
    %412 = arith.subf %411, %405 : vector<8x32xf32>
    %413 = arith.mulf %412, %410 : vector<8x32xf32>
    %414 = arith.mulf %405, %390 : vector<8x32xf32>
    %415 = arith.addf %413, %414 : vector<8x32xf32>
    %416 = vector.extract_strided_slice %342 {offsets = [24, 0], sizes = [8, 128], strides = [1, 1]} : vector<40x128xf32> to vector<8x128xf32>
    %417 = arith.truncf %415 : vector<8x32xf32> to vector<8x32xbf16>
    %cst_184 = arith.constant dense<0.000000e+00> : vector<8x128xf32>
    %418 = tpu.matmul %417, %344, %cst_184 {dimension_numbers = #tpu.dot_dimension_numbers<[1], [0], [0], [1], [0, 0, 1, 1], [], []>} : vector<8x32xbf16>, vector<32x128xbf16>, vector<8x128xf32> -> vector<8x128xf32>
    %419 = vector.broadcast %338 : vector<1x128xf32> to vector<8x128xf32>
    %420 = arith.addf %418, %419 : vector<8x128xf32>
    %421 = vector.extract_strided_slice %416 {offsets = [0, 0], sizes = [8, 64], strides = [1, 1]} : vector<8x128xf32> to vector<8x64xf32>
    %422 = vector.extract_strided_slice %420 {offsets = [0, 0], sizes = [8, 64], strides = [1, 1]} : vector<8x128xf32> to vector<8x64xf32>
    %423 = arith.addf %421, %422 : vector<8x64xf32>
    %424 = arith.negf %423 : vector<8x64xf32>
    %425 = math.exp %424 : vector<8x64xf32>
    %cst_185 = arith.constant 1.000000e+00 : f32
    %426 = vector.broadcast %cst_185 : f32 to vector<8x64xf32>
    %427 = arith.addf %426, %425 : vector<8x64xf32>
    %428 = arith.divf %426, %427 : vector<8x64xf32>
    %429 = vector.extract_strided_slice %428 {offsets = [0, 0], sizes = [8, 32], strides = [1, 1]} : vector<8x64xf32> to vector<8x32xf32>
    %430 = vector.extract_strided_slice %428 {offsets = [0, 32], sizes = [8, 32], strides = [1, 1]} : vector<8x64xf32> to vector<8x32xf32>
    %431 = vector.extract_strided_slice %416 {offsets = [0, 64], sizes = [8, 32], strides = [1, 1]} : vector<8x128xf32> to vector<8x32xf32>
    %432 = vector.extract_strided_slice %420 {offsets = [0, 64], sizes = [8, 32], strides = [1, 1]} : vector<8x128xf32> to vector<8x32xf32>
    %433 = arith.mulf %429, %432 : vector<8x32xf32>
    %434 = arith.addf %431, %433 : vector<8x32xf32>
    %435 = math.tanh %434 : vector<8x32xf32>
    %cst_186 = arith.constant 1.000000e+00 : f32
    %436 = vector.broadcast %cst_186 : f32 to vector<8x32xf32>
    %437 = arith.subf %436, %430 : vector<8x32xf32>
    %438 = arith.mulf %437, %435 : vector<8x32xf32>
    %439 = arith.mulf %430, %415 : vector<8x32xf32>
    %440 = arith.addf %438, %439 : vector<8x32xf32>
    %441 = vector.extract_strided_slice %342 {offsets = [32, 0], sizes = [8, 128], strides = [1, 1]} : vector<40x128xf32> to vector<8x128xf32>
    %442 = arith.truncf %440 : vector<8x32xf32> to vector<8x32xbf16>
    %cst_187 = arith.constant dense<0.000000e+00> : vector<8x128xf32>
    %443 = tpu.matmul %442, %344, %cst_187 {dimension_numbers = #tpu.dot_dimension_numbers<[1], [0], [0], [1], [0, 0, 1, 1], [], []>} : vector<8x32xbf16>, vector<32x128xbf16>, vector<8x128xf32> -> vector<8x128xf32>
    %444 = vector.broadcast %338 : vector<1x128xf32> to vector<8x128xf32>
    %445 = arith.addf %443, %444 : vector<8x128xf32>
    %446 = vector.extract_strided_slice %441 {offsets = [0, 0], sizes = [8, 64], strides = [1, 1]} : vector<8x128xf32> to vector<8x64xf32>
    %447 = vector.extract_strided_slice %445 {offsets = [0, 0], sizes = [8, 64], strides = [1, 1]} : vector<8x128xf32> to vector<8x64xf32>
    %448 = arith.addf %446, %447 : vector<8x64xf32>
    %449 = arith.negf %448 : vector<8x64xf32>
    %450 = math.exp %449 : vector<8x64xf32>
    %cst_188 = arith.constant 1.000000e+00 : f32
    %451 = vector.broadcast %cst_188 : f32 to vector<8x64xf32>
    %452 = arith.addf %451, %450 : vector<8x64xf32>
    %453 = arith.divf %451, %452 : vector<8x64xf32>
    %454 = vector.extract_strided_slice %453 {offsets = [0, 0], sizes = [8, 32], strides = [1, 1]} : vector<8x64xf32> to vector<8x32xf32>
    %455 = vector.extract_strided_slice %453 {offsets = [0, 32], sizes = [8, 32], strides = [1, 1]} : vector<8x64xf32> to vector<8x32xf32>
    %456 = vector.extract_strided_slice %441 {offsets = [0, 64], sizes = [8, 32], strides = [1, 1]} : vector<8x128xf32> to vector<8x32xf32>
    %457 = vector.extract_strided_slice %445 {offsets = [0, 64], sizes = [8, 32], strides = [1, 1]} : vector<8x128xf32> to vector<8x32xf32>
    %458 = arith.mulf %454, %457 : vector<8x32xf32>
    %459 = arith.addf %456, %458 : vector<8x32xf32>
    %460 = math.tanh %459 : vector<8x32xf32>
    %cst_189 = arith.constant 1.000000e+00 : f32
    %461 = vector.broadcast %cst_189 : f32 to vector<8x32xf32>
    %462 = arith.subf %461, %455 : vector<8x32xf32>
    %463 = arith.mulf %462, %460 : vector<8x32xf32>
    %464 = arith.mulf %455, %440 : vector<8x32xf32>
    %465 = arith.addf %463, %464 : vector<8x32xf32>
    %c128 = arith.constant 128 : index
    %c0_190 = arith.constant 0 : index
    %466 = vector.load %arg3[%c128, %c0_190] : memref<208x128xf32, #tpu.memory_space<vmem>>, vector<32x128xf32>
    %467 = arith.truncf %466 : vector<32x128xf32> to vector<32x128xbf16>
    %c204 = arith.constant 204 : index
    %c0_191 = arith.constant 0 : index
    %468 = vector.load %arg3[%c204, %c0_191] : memref<208x128xf32, #tpu.memory_space<vmem>>, vector<1x128xf32>
    %c205 = arith.constant 205 : index
    %c0_192 = arith.constant 0 : index
    %469 = vector.load %arg3[%c205, %c0_192] : memref<208x128xf32, #tpu.memory_space<vmem>>, vector<1x128xf32>
    %470 = arith.truncf %333 : vector<1x32xf32> to vector<1x32xbf16>
    %cst_193 = arith.constant dense<0.000000e+00> : vector<1x128xf32>
    %471 = tpu.matmul %470, %467, %cst_193 {dimension_numbers = #tpu.dot_dimension_numbers<[1], [0], [0], [1], [0, 0, 1, 1], [], []>} : vector<1x32xbf16>, vector<32x128xbf16>, vector<1x128xf32> -> vector<1x128xf32>
    %472 = arith.addf %471, %468 : vector<1x128xf32>
    %473 = vector.extract_strided_slice %472 {offsets = [0, 0], sizes = [1, 64], strides = [1, 1]} : vector<1x128xf32> to vector<1x64xf32>
    %474 = vector.extract_strided_slice %469 {offsets = [0, 0], sizes = [1, 64], strides = [1, 1]} : vector<1x128xf32> to vector<1x64xf32>
    %475 = arith.addf %473, %474 : vector<1x64xf32>
    %476 = arith.negf %475 : vector<1x64xf32>
    %477 = math.exp %476 : vector<1x64xf32>
    %cst_194 = arith.constant 1.000000e+00 : f32
    %478 = vector.broadcast %cst_194 : f32 to vector<1x64xf32>
    %479 = arith.addf %478, %477 : vector<1x64xf32>
    %480 = arith.divf %478, %479 : vector<1x64xf32>
    %481 = vector.extract_strided_slice %480 {offsets = [0, 0], sizes = [1, 32], strides = [1, 1]} : vector<1x64xf32> to vector<1x32xf32>
    %482 = vector.extract_strided_slice %480 {offsets = [0, 32], sizes = [1, 32], strides = [1, 1]} : vector<1x64xf32> to vector<1x32xf32>
    %483 = vector.extract_strided_slice %472 {offsets = [0, 64], sizes = [1, 32], strides = [1, 1]} : vector<1x128xf32> to vector<1x32xf32>
    %484 = vector.extract_strided_slice %469 {offsets = [0, 64], sizes = [1, 32], strides = [1, 1]} : vector<1x128xf32> to vector<1x32xf32>
    %485 = arith.mulf %481, %484 : vector<1x32xf32>
    %486 = arith.addf %483, %485 : vector<1x32xf32>
    %487 = math.tanh %486 : vector<1x32xf32>
    %cst_195 = arith.constant 1.000000e+00 : f32
    %488 = vector.broadcast %cst_195 : f32 to vector<1x32xf32>
    %489 = arith.subf %488, %482 : vector<1x32xf32>
    %490 = arith.mulf %489, %487 : vector<1x32xf32>
    %c160 = arith.constant 160 : index
    %c0_196 = arith.constant 0 : index
    %491 = vector.load %arg3[%c160, %c0_196] : memref<208x128xf32, #tpu.memory_space<vmem>>, vector<32x128xf32>
    %492 = arith.truncf %491 : vector<32x128xf32> to vector<32x128xbf16>
    %493 = arith.truncf %490 : vector<1x32xf32> to vector<1x32xbf16>
    %cst_197 = arith.constant dense<0.000000e+00> : vector<1x128xf32>
    %494 = tpu.matmul %493, %492, %cst_197 {dimension_numbers = #tpu.dot_dimension_numbers<[1], [0], [0], [1], [0, 0, 1, 1], [], []>} : vector<1x32xbf16>, vector<32x128xbf16>, vector<1x128xf32> -> vector<1x128xf32>
    %495 = vector.extract_strided_slice %494 {offsets = [0, 0], sizes = [1, 1], strides = [1, 1]} : vector<1x128xf32> to vector<1x1xf32>
    %496 = vector.extract_strided_slice %494 {offsets = [0, 1], sizes = [1, 1], strides = [1, 1]} : vector<1x128xf32> to vector<1x1xf32>
    %c206 = arith.constant 206 : index
    %c1_198 = arith.constant 1 : index
    %497 = vector.load %arg3[%c206, %c1_198] : memref<208x128xf32, #tpu.memory_space<vmem>>, vector<1x1xf32>
    %498 = arith.addf %496, %497 : vector<1x1xf32>
    %c192 = arith.constant 192 : index
    %c0_199 = arith.constant 0 : index
    %499 = vector.load %arg3[%c192, %c0_199] : memref<208x128xf32, #tpu.memory_space<vmem>>, vector<1x32xf32>
    %500 = arith.truncf %499 : vector<1x32xf32> to vector<1x32xbf16>
    %501 = arith.truncf %465 : vector<8x32xf32> to vector<8x32xbf16>
    %cst_200 = arith.constant dense<0.000000e+00> : vector<1x8xf32>
    %502 = tpu.matmul %500, %501, %cst_200 {dimension_numbers = #tpu.dot_dimension_numbers<[1], [1], [0], [0], [0, 0, 1, 0], [], []>} : vector<1x32xbf16>, vector<8x32xbf16>, vector<1x8xf32> -> vector<1x8xf32>
    %c206_201 = arith.constant 206 : index
    %c0_202 = arith.constant 0 : index
    %503 = vector.load %arg3[%c206_201, %c0_202] : memref<208x128xf32, #tpu.memory_space<vmem>>, vector<1x1xf32>
    %504 = vector.broadcast %495 : vector<1x1xf32> to vector<1x8xf32>
    %505 = arith.addf %504, %502 : vector<1x8xf32>
    %506 = vector.broadcast %503 : vector<1x1xf32> to vector<1x8xf32>
    %507 = arith.addf %505, %506 : vector<1x8xf32>
    %cst_203 = arith.constant 0.000000e+00 : f32
    %508 = vector.broadcast %cst_203 : f32 to vector<1x8xf32>
    %509 = arith.maximumf %507, %508 : vector<1x8xf32>
    %cst_204 = arith.constant dense<0xFF800000> : vector<1xf32>
    %510 = vector.multi_reduction <maximumf>, %509, %cst_204 [1] : vector<1x8xf32> to vector<1xf32>
    %511 = vector.shape_cast %510 : vector<1xf32> to vector<1x1xf32>
    %512 = vector.broadcast %511 : vector<1x1xf32> to vector<1x8xf32>
    %513 = arith.subf %509, %512 : vector<1x8xf32>
    %514 = math.exp %513 : vector<1x8xf32>
    %cst_205 = arith.constant dense<0.000000e+00> : vector<1xf32>
    %515 = vector.multi_reduction <add>, %514, %cst_205 [1] : vector<1x8xf32> to vector<1xf32>
    %516 = vector.shape_cast %515 : vector<1xf32> to vector<1x1xf32>
    %517 = vector.broadcast %516 : vector<1x1xf32> to vector<1x8xf32>
    %518 = arith.divf %514, %517 : vector<1x8xf32>
    %519 = vector.shape_cast %498 : vector<1x1xf32> to vector<1x1xf32>
    %520 = vector.broadcast %519 : vector<1x1xf32> to vector<1x8xf32>
    %521 = tpu.concatenate %509, %518, %520 in 0 : vector<1x8xf32>, vector<1x8xf32>, vector<1x8xf32> -> vector<3x8xf32>
    %c0_206 = arith.constant 0 : index
    %c0_207 = arith.constant 0 : index
    %522 = vector.load %arg4[%c0_206, %c0_207] : memref<3x8xf32, #tpu.memory_space<vmem>>, vector<3x8xf32>
    tpu.vector_store %arg4[%c0_206, %c0_207], %521 {strides = array<i32>} : memref<3x8xf32, #tpu.memory_space<vmem>>, vector<3x8xf32>,
    return
  }
}

</mosaic_0001>

<bundles_post_ra>
// kernel: tpu_custom_call.1
= control target key start
LH: loop header
LB: loop body
LE: loop exit
PB: predicated region body
PF: predicated region fallthrough
CT: control target
= control target key end

     0   :  { %9 = vsyncpa [#allocation7], 0  ;;  %s2350_s0 = inlined_call_operand.vmem [shape: s32[6], index: 0, kind: input, shape index: {}]   ;;  %s2351_s1 = inlined_call_operand.vmem [shape: s32[40], index: 1, kind: input, shape index: {}]   ;;  %s2352_s2 = inlined_call_operand.vmem [shape: f32[100,32], index: 2, kind: input, shape index: {}]   ;;  %s2353_s3 = inlined_call_operand.hbm [shape: f32[208,128], index: 3, kind: input, shape index: {}]   ;;  %s2354_s4 = inlined_call_operand.hbm [shape: f32[3,8], index: 4, kind: output, shape index: {}]  }
   0x1   :  { %10 = vsyncpa [#allocation9], 0 }
   0x2   :  { %11 = vsyncpa [#allocation5], 0 }
   0x3   :  { %12 = vsyncpa [#allocation6], 0  ;;  %s19_s17 = sshll.u32 %s2350_s0, 4  ;;  %s29_s20 = sshll.u32 %s2351_s1, 4  ;;  %s20_s17 = int_to_ptr.vmem [resolvable:$true] %s19_s17  ;;  %s30_s20 = int_to_ptr.vmem [resolvable:$true] %s29_s20 }
   0x4   :  { %s1758_s21 = scalar_lea.vmem %s20_s17, 16  ;;  %p1763_p1 = scmp.lt.s32.totalorder %s20_s17, %s20_s17 }
   0x5   :  { %p1759_p0 = scmp.ne.s32.totalorder %s20_s17, %s1758_s21  ;;  %p1764_p2 = scmp.lt.s32.totalorder %s1758_s21, %s1758_s21 }
   0x7   :  { %p1765_p3 = por %p1764_p2, %p1763_p1 }
   0x9   :  { %p1766_p4 = pnand %p1765_p3, %p1759_p0 }
   0xb   :  { %1769 = shalt.err (!%p1766_p4)
}
   0xc   :  { %s1834_s22 = smov [#allocation4]   ;;  %s1770_s23 = scalar_lea.vmem %s30_s20, 16 }
   0xd   :  { %22 = dma.vmem_to_smem %s20_s17, 16, %s1834_s22, [#allocation7]  }
   0xe   :  { %p1771_p5 = scmp.ne.s32.totalorder %s30_s20, %s1770_s23  ;;  %p1775_p6 = scmp.lt.s32.totalorder %s30_s20, %s30_s20 }
   0xf   :  { %p1776_p7 = scmp.lt.s32.totalorder %s1770_s23, %s1770_s23 }
  0x11   :  { %p1777_p8 = por %p1776_p7, %p1775_p6 }
  0x13   :  { %p1778_p9 = pnand %p1777_p8, %p1771_p5 }
  0x15   :  { %1781 = shalt.err (!%p1778_p9)
}
  0x16   :  { %s1835_s0 = smov [#allocation8]   ;;  %s1836_s1 = smov [#allocation10]  }
  0x17   :  { %32 = dma.vmem_to_smem %s30_s20, 16, %s1835_s0, [#allocation9]  }
  0x18   :  { %s40_s24 = sshll.u32 %s1836_s1, 4  ;;  %s1782_s27 = scalar_lea.hbm %s2353_s3, 3328  ;;  %s41_s24 = int_to_ptr.vmem [resolvable:$true] %s40_s24 }
  0x19   :  { %p1783_p10 = scmp.ne.s32.totalorder %s2353_s3, %s1782_s27  ;;  %p1786_p11 = scmp.lt.u32.totalorder %s1782_s27, %s2353_s3 }
  0x1b   :  { %p1788_p12 = pnand %p1786_p11, %p1783_p10 }
  0x1d   :  { %1791 = shalt.err (!%p1788_p12)
}
  0x1e   :  { %s1792_s6 = scalar_lea.vmem %s41_s24, 3328  ;;  %p1797_p0 = scmp.lt.s32.totalorder %s41_s24, %s41_s24 }
  0x1f   :  { %p1793_p13 = scmp.ne.s32.totalorder %s41_s24, %s1792_s6  ;;  %p1798_p1 = scmp.lt.s32.totalorder %s1792_s6, %s1792_s6 }
  0x21   :  { %p1799_p2 = por %p1798_p1, %p1797_p0 }
  0x23   :  { %p1800_p3 = pnand %p1799_p2, %p1793_p13 }
  0x25   :  { %1803 = shalt.err (!%p1800_p3)
}
  0x26   :  { %s1837_s7 = smov 128   ;;  %s1838_s8 = smov 8  }
  0x27   :  { %46 = dma.hbm_to_vmem [thread:$0]  %s2353_s3, 3328, %s41_s24, [#allocation5], %s1837_s7, %s1837_s7, %s1838_s8  }
  0x28   :  { %1826 = dma.done.wait [#allocation7], 16  }
  0x29   :  { %1827 = vsyncadd [#allocation7], 4294967280 }
  0x2a   :  { %1828 = dma.done.wait [#allocation9], 16  }
  0x2b   :  { %1829 = vsyncadd [#allocation9], 4294967280 }
  0x2c   :  { %1830 = dma.done.wait [#allocation5], 3328  }
  0x2d   :  { %1831 = vsyncadd [#allocation5], 4294963968 }
  0x2e   :  { %56 = sfence }
  0x2f   :  { %v244_v0 = vld [vmem:[#allocation10] sm:$0xff]  ;;  %v245_v1 = vld [vmem:[#allocation10 + $0x8] sm:$0xff]  ;;  %v246_v2 = vld [vmem:[#allocation10 + $0x10] sm:$0xff]  ;;  %v1839_v3 = vmov 0.0   ;;  %vm1840_vm0 = vmmov 0   ;;  %s58_s3 = sld [smem:[#allocation4]] }
  0x30   :  { %1549 = vmatprep.subr.bf16.mxu0 %v1839_v3  ;;  %v248_v4 = vpack.c.bf16 %v245_v1, %v244_v0  ;;  %v247_v5 = vld [vmem:[#allocation10 + $0x18] sm:$0xff]  ;;  %1553 = vmatprep.mubr.msk.bf16.mxu0 %vm1840_vm0, %v1839_v3  ;;  %s1431_s11 = sld [smem:[#allocation4 + $0x1]]  ;;  %s1432_s12 = sld [smem:[#allocation4 + $0x2]]  ;;  %v1892_v6 = vld [vmem:[#allocation10 + $0xc9] sm:$0x1]  ;;  %vm61_vm1 = vcmask 253952  }
  0x31   :  { %s1433_s13 = sld [smem:[#allocation4 + $0x3]]  ;;  %1557 = vmatprep.subr.bf16.mxu1 %v1839_v3  ;;  %1561 = vmatprep.mubr.msk.bf16.mxu1 %vm1840_vm0, %v1839_v3  ;;  %v249_v7 = vpack.c.bf16 %v247_v5, %v246_v2  ;;  %s1434_s14 = sld [smem:[#allocation4 + $0x4]]  ;;  %vm257_vm2 = vcmask 261120   ;;  %v1475_v16 = vld [vmem:[#allocation10 + $0xc8] ss:$0 sm:$0xff]  ;;  %v301_v31 = vld [vmem:[#allocation10 + $0x20] sm:$0xff] }
  0x32   :  { %1550 = vmatpush3.bf16.msra.mxu0 %v248_v4  ;;  %s1435_s15 = sld [smem:[#allocation4 + $0x5]]  ;;  %s1841_s16 = smov 64   ;;  %v302_v32 = vld [vmem:[#allocation10 + $0x28] sm:$0xff]  ;;  %v303_v33 = vld [vmem:[#allocation10 + $0x30] sm:$0xff]  ;;  %v304_v35 = vld [vmem:[#allocation10 + $0x38] sm:$0xff]  ;;  %vm1341_vm3 = vcmask 57344  }
  0x33   :  { %1551 = vmatprep.subr.bf16.mxu0 %v1839_v3  ;;  %315 = vrot.lane.b32.xlu0 %v1892_v6, %s1841_s16  ;;  %v1934_v34 = vpack.c.bf16 %v302_v32, %v301_v31  ;;  %v1937_v36 = vpack.c.bf16 %v304_v35, %v303_v33  ;;  %s1842_s7 = smov 96   ;;  %s83_s8 = sld [smem:[#allocation8]]  ;;  %vm1362_vm4 = vcmask 1040384   ;;  %vm1364_vm5 = vcmask 1041408  }
  0x34   :  { %s1436_s9 = sld [smem:[#allocation8 + $0x1]]  ;;  %s1437_s10 = sld [smem:[#allocation8 + $0x2]]  ;;  %vm1366_vm6 = vcmask 59392  }
  0x35   :  { %s59_s19 = scalar_lea.vmem %s2352_s2, %s58_s3  ;;  %1558 = vmatpush3.bf16.msra.mxu1 %v1934_v34  ;;  %s1438_s3 = sld [smem:[#allocation8 + $0x3]] }
  0x36   :  { %1552 = vmatpush3.bf16.msra.mxu0 %v249_v7  ;;  %s64_s22 = scalar_lea.vmem %s2352_s2, %s1431_s11  ;;  %v60_v8 = vld [vmem:[%s59_s19] sm:$0x1]  ;;  %s68_s1 = scalar_lea.vmem %s2352_s2, %s1432_s12  ;;  %1559 = vmatprep.subr.bf16.mxu1 %v1839_v3 }
  0x37   :  { %v65_v9 = vld [vmem:[%s64_s22] sm:$0x1]  ;;  %s72_s26 = scalar_lea.vmem %s2352_s2, %s1433_s13  ;;  %1565 = vmatprep.subr.bf16.mxu0 %v1839_v3  ;;  %62 = vst.msk [vmem:[#allocation2] sm:$0x1] %vm61_vm1, %v60_v8  ;;  %s76_s29 = scalar_lea.vmem %s2352_s2, %s1434_s14 }
  0x38   :  { %66 = vst.msk [vmem:[#allocation2 + $0x1] sm:$0x1] %vm61_vm1, %v65_v9  ;;  %v69_v10 = vld [vmem:[%s68_s1] sm:$0x1]  ;;  %s80_s6 = scalar_lea.vmem %s2352_s2, %s1435_s15  ;;  %s1439_s11 = sld [smem:[#allocation8 + $0x4]] }
  0x39   :  { %v73_v11 = vld [vmem:[%s72_s26] sm:$0x1]  ;;  %70 = vst.msk [vmem:[#allocation2 + $0x2] sm:$0x1] %vm61_vm1, %v69_v10  ;;  %1560 = vmatpush3.bf16.msra.mxu1 %v1937_v36  ;;  %s1440_s12 = sld [smem:[#allocation8 + $0x5]]  ;;  %s1441_s13 = sld [smem:[#allocation8 + $0x6]] }
  0x3a   :  { %74 = vst.msk [vmem:[#allocation2 + $0x3] sm:$0x1] %vm61_vm1, %v73_v11  ;;  %v77_v12 = vld [vmem:[%s76_s29] sm:$0x1]  ;;  %1573 = vmatprep.subr.bf16.mxu1 %v1839_v3  ;;  %s1442_s14 = sld [smem:[#allocation8 + $0x7]]  ;;  %s1993_s15 = sld [smem:[#allocation8 + $0x8]] }
  0x3b   :  { %v81_v13 = vld [vmem:[%s80_s6] sm:$0x1]  ;;  %78 = vst.msk [vmem:[#allocation2 + $0x4] sm:$0x1] %vm61_vm1, %v77_v12  ;;  %s1995_s17 = sld [smem:[#allocation8 + $0x9]]  ;;  %s1997_s18 = sld [smem:[#allocation8 + $0xa]] }
  0x3c   :  { %82 = vst.msk [vmem:[#allocation2 + $0x5] sm:$0x1] %vm61_vm1, %v81_v13  ;;  %s1999_s19 = sld [smem:[#allocation8 + $0xb]]  ;;  %s84_s22 = scalar_lea.vmem %s2352_s2, %s83_s8 }
  0x3d   :  { %s88_s1 = scalar_lea.vmem %s2352_s2, %s1436_s9  ;;  %s92_s26 = scalar_lea.vmem %s2352_s2, %s1437_s10 }
  0x3e   :  { %s96_s29 = scalar_lea.vmem %s2352_s2, %s1438_s3  ;;  %s100_s6 = scalar_lea.vmem %s2352_s2, %s1439_s11 }
  0x3f   :  { %s104_s20 = scalar_lea.vmem %s2352_s2, %s1440_s12  ;;  %s108_s21 = scalar_lea.vmem %s2352_s2, %s1441_s13 }
  0x40   :  { %s112_s0 = scalar_lea.vmem %s2352_s2, %s1442_s14  ;;  %s1448_s30 = sld [smem:[#allocation8 + $0xd]] }
  0x41   :  { %s120_s13 = scalar_lea.vmem %s2352_s2, %s1995_s17  ;;  %s124_s27 = scalar_lea.vmem %s2352_s2, %s1997_s18 }
  0x42   :  { %s1447_s17 = sld [smem:[#allocation8 + $0xc]]  ;;  %s1449_s5 = sld [smem:[#allocation8 + $0xe]] }
  0x43   :  { %v243_v14 = vld [vmem:[#allocation2] sm:$0x3f]  ;;  %s1450_s18 = sld [smem:[#allocation8 + $0xf]]  ;;  %s1451_s12 = sld [smem:[#allocation8 + $0x10]] }
  0x44   :  { %v252_v15 = vpack.c.bf16 %v243_v14, %v243_v14  ;;  %s1453_s24 = sld [smem:[#allocation8 + $0x12]]  ;;  %s1454_s25 = sld [smem:[#allocation8 + $0x13]] }
  0x45   :  { %s1456_s14 = sld [smem:[#allocation8 + $0x15]]  ;;  %s2145_s28 = sld [smem:[#allocation8 + $0x18]] }
  0x46   :  { %1554 = vmatmul.mubr.msk.bf16.vlgmr.msra.gmra.mrb[0].mxu0 %vm257_vm2, %v252_v15  ;;  %s136_s10 = scalar_lea.vmem %s2352_s2, %s1448_s30  ;;  %s1469_s9 = sld [smem:[#allocation8 + $0x22]] }
  0x47   :  { %1569 = vmatprep.mubr.msk.bf16.mxu0 %vm1840_vm0, %v1839_v3  ;;  %1566 = vmatpush3.bf16.msra.mxu0 %v1934_v34 }
  0x48   :  { %1567 = vmatprep.subr.bf16.mxu0 %v1839_v3  ;;  %s132_s8 = scalar_lea.vmem %s2352_s2, %s1447_s17  ;;  %s2151_s17 = sld [smem:[#allocation8 + $0x1b]] }
  0x49   :  { %s144_s11 = scalar_lea.vmem %s2352_s2, %s1450_s18  ;;  %s148_s18 = scalar_lea.vmem %s2352_s2, %s1451_s12 }
  0x4b   :  { %1568 = vmatpush3.bf16.msra.mxu0 %v1937_v36 }
  0x4c   :  { %1581 = vmatprep.subr.bf16.mxu0 %v1839_v3 }
  0x4e   :  { %s192_s23 = scalar_lea.vmem %s2352_s2, %s2151_s17 }
  0xa5   :  { %v316_v26 = vpop.permute.xlu0 %315 }
 0x119   :  { %v295_v17 = vpop.f32.mrb[0].mxu0 }
 0x11a   :  { %v1928_v18 = vadd.f32 %v1475_v16, %v295_v17  ;;  %v1555_v19 = vpop.f32.mrb[1].mxu0 }
 0x11b   :  { %v298_v20 = vpop.f32.mrb[2].mxu0 }
 0x11c   :  { %v1556_v21 = vpop.f32.mrb[3].mxu0  ;;  %v307_v22 = vadd.f32 %v1928_v18, %v1892_v6 }
 0x11e   :  { %v1477_v23 = vmul.f32 -1.442695, %v307_v22 }
 0x120   :  { %1682 = vpow2.f32 %v1477_v23 }
 0x12a   :  { %v1683_v24 = vpop.eup %1682 }
 0x12b   :  { %v311_v25 = vadd.f32 1.0, %v1683_v24 }
 0x12d   :  { %1684 = vrcp.f32 %v311_v25 }
 0x137   :  { %v1685_v27 = vpop.eup %1684 }
 0x138   :  { %v318_v28 = vmul.f32 %v1685_v27, %v316_v26  ;;  %v325_v38 = vsub.f32 1.0, %v1685_v27 }
 0x13a   :  { %320 = vrot.lane.b32.xlu0 %v318_v28, %s1841_s16 }
 0x1ac   :  { %v321_v29 = vpop.permute.xlu0 %320 }
 0x1ad   :  { %v323_v30 = vadd.f32 %v321_v29, %v1928_v18 }
 0x1af   :  { %1686 = vtanh.f32 %v323_v30 }
 0x1b9   :  { %v1687_v37 = vpop.eup %1686 }
 0x1ba   :  { %327 = vrot.lane.b32.xlu1 %v1687_v37, %s1842_s7 }
 0x22c   :  { %v328_v39 = vpop.permute.xlu1 %327 }
 0x22d   :  { %v330_v40 = vmul.f32 %v328_v39, %v325_v38 }
 0x22f   :  { %v331_v41 = vpack.c.bf16 %v330_v40, %v330_v40  ;;  %v405_v59 = vrot.slane %v330_v40, 7 }
 0x231   :  { %333 = vrot.lane.b32.xlu1 %v331_v41, %s1842_s7 }
 0x2a3   :  { %v334_v42 = vpop.permute.xlu1 %333 }
 0x2a4   :  { %1562 = vmatmul.mubr.msk.bf16.vlgmr.msra.gmra.mrb[0].mxu1 %vm257_vm2, %v334_v42 }
 0x2a5   :  { %1574 = vmatpush3.bf16.msra.mxu1 %v1934_v34  ;;  %1577 = vmatprep.mubr.msk.bf16.mxu1 %vm1840_vm0, %v1839_v3 }
 0x2a6   :  { %1575 = vmatprep.subr.bf16.mxu1 %v1839_v3 }
 0x2a9   :  { %1576 = vmatpush3.bf16.msra.mxu1 %v1937_v36 }
 0x2aa   :  { %1589 = vmatprep.subr.bf16.mxu1 %v1839_v3 }
 0x377   :  { %v372_v43 = vpop.f32.mrb[0].mxu1 }
 0x378   :  { %v373_v44 = vadd.f32 %v372_v43, %v1892_v6  ;;  %v1563_v45 = vpop.f32.mrb[1].mxu1 }
 0x379   :  { %v375_v46 = vpop.f32.mrb[2].mxu1 }
 0x37a   :  { %v379_v47 = vrot.slane %v373_v44, 7  ;;  %v1564_v48 = vpop.f32.mrb[3].mxu1 }
 0x37b   :  { %v85_v48 = vld [vmem:[%s84_s22] sm:$0x1]  ;;  %s140_s22 = scalar_lea.vmem %s2352_s2, %s1449_s5 }
 0x37c   :  { %388 = vrot.lane.b32.xlu0 %v379_v47, %s1841_s16  ;;  %v381_v49 = vadd.f32 %v379_v47, %v1928_v18  ;;  %86 = vst.msk [vmem:[#allocation3] sm:$0x1] %vm61_vm1, %v85_v48 }
 0x37e   :  { %v1479_v50 = vmul.f32 -1.442695, %v381_v49  ;;  %v89_v49 = vld [vmem:[%s88_s1] sm:$0x1]  ;;  %s116_s1 = scalar_lea.vmem %s2352_s2, %s1993_s15  ;;  %s128_s15 = scalar_lea.vmem %s2352_s2, %s1999_s19 }
 0x37f   :  { %90 = vst.msk [vmem:[#allocation3 + $0x1] sm:$0x1] %vm61_vm1, %v89_v49 }
 0x380   :  { %1688 = vpow2.f32 %v1479_v50  ;;  %v93_v50 = vld [vmem:[%s92_s26] sm:$0x1]  ;;  %s1457_s26 = sld [smem:[#allocation8 + $0x16]] }
 0x381   :  { %94 = vst.msk [vmem:[#allocation3 + $0x2] sm:$0x1] %vm61_vm1, %v93_v50 }
 0x386   :  { %s172_s5 = scalar_lea.vmem %s2352_s2, %s1457_s26  ;;  %s1472_s26 = sld [smem:[#allocation8 + $0x25]] }
 0x38a   :  { %v1689_v51 = vpop.eup %1688 }
 0x38b   :  { %v385_v52 = vadd.f32 1.0, %v1689_v51  ;;  %v97_v51 = vld [vmem:[%s96_s29] sm:$0x1]  ;;  %s2147_s29 = sld [smem:[#allocation8 + $0x19]] }
 0x38c   :  { %98 = vst.msk [vmem:[#allocation3 + $0x3] sm:$0x1] %vm61_vm1, %v97_v51 }
 0x38d   :  { %1690 = vrcp.f32 %v385_v52  ;;  %v101_v52 = vld [vmem:[%s100_s6] sm:$0x1]  ;;  %s1467_s6 = sld [smem:[#allocation8 + $0x20]] }
 0x38e   :  { %102 = vst.msk [vmem:[#allocation3 + $0x4] sm:$0x1] %vm61_vm1, %v101_v52 }
 0x397   :  { %v1691_v53 = vpop.eup %1690 }
 0x398   :  { %v398_v60 = vsub.f32 1.0, %v1691_v53  ;;  %v407_v62 = vmul.f32 %v1691_v53, %v405_v59  ;;  %v121_v59 = vld [vmem:[%s120_s13] sm:$0x1]  ;;  %s1455_s13 = sld [smem:[#allocation8 + $0x14]] }
 0x399   :  { %122 = vst.msk [vmem:[#allocation3 + $0x9] sm:$0x1] %vm61_vm1, %v121_v59  ;;  %v813_v59 = vld [vmem:[#allocation10 + $0x60] sm:$0xff] }
 0x3ee   :  { %v389_v54 = vpop.permute.xlu0 %388 }
 0x3ef   :  { %v391_v55 = vmul.f32 %v1691_v53, %v389_v54  ;;  %v105_v53 = vld [vmem:[%s104_s20] sm:$0x1]  ;;  %s1470_s20 = sld [smem:[#allocation8 + $0x23]] }
 0x3f0   :  { %106 = vst.msk [vmem:[#allocation3 + $0x5] sm:$0x1] %vm61_vm1, %v105_v53  ;;  %v109_v54 = vld [vmem:[%s108_s21] sm:$0x1] }
 0x3f1   :  { %393 = vrot.lane.b32.xlu1 %v391_v55, %s1841_s16  ;;  %v113_v55 = vld [vmem:[%s112_s0] sm:$0x1]  ;;  %110 = vst.msk [vmem:[#allocation3 + $0x6] sm:$0x1] %vm61_vm1, %v109_v54  ;;  %s1465_s0 = sld [smem:[#allocation8 + $0x1e]] }
 0x3f2   :  { %114 = vst.msk [vmem:[#allocation3 + $0x7] sm:$0x1] %vm61_vm1, %v113_v55 }
 0x463   :  { %v394_v56 = vpop.permute.xlu1 %393 }
 0x464   :  { %v396_v57 = vadd.f32 %v394_v56, %v1928_v18 }
 0x466   :  { %1692 = vtanh.f32 %v396_v57 }
 0x470   :  { %v1693_v58 = vpop.eup %1692 }
 0x471   :  { %400 = vrot.lane.b32.xlu0 %v1693_v58, %s1842_s7  ;;  %v117_v58 = vld [vmem:[%s116_s1] sm:$0x1]  ;;  %s1452_s1 = sld [smem:[#allocation8 + $0x11]] }
 0x472   :  { %118 = vst.msk [vmem:[#allocation3 + $0x8] sm:$0x1] %vm61_vm1, %v117_v58 }
 0x4e3   :  { %v401_v61 = vpop.permute.xlu0 %400 }
 0x4e4   :  { %v403_v63 = vmul.f32 %v401_v61, %v398_v60  ;;  %v125_v61 = vld [vmem:[%s124_s27] sm:$0x1]  ;;  %s1458_s27 = sld [smem:[#allocation8 + $0x17]] }
 0x4e5   :  { %126 = vst.msk [vmem:[#allocation3 + $0xa] sm:$0x1] %vm61_vm1, %v125_v61 }
 0x4e6   :  { %v408_v0 = vadd.f32 %v407_v62, %v403_v63 }
 0x4e8   :  { %v409_v1 = vpack.c.bf16 %v408_v0, %v408_v0  ;;  %v485_v23 = vrot.slane %v408_v0, 7  ;;  %v129_v0 = vld [vmem:[%s128_s15] sm:$0x1]  ;;  %s2149_s15 = sld [smem:[#allocation8 + $0x1a]] }
 0x4e9   :  { %130 = vst.msk [vmem:[#allocation3 + $0xb] sm:$0x1] %vm61_vm1, %v129_v0 }
 0x4ea   :  { %v411_v2 = vshrl.u32 %v409_v1, 16 }
 0x4ec   :  { %413 = vrot.lane.b32.xlu1 %v411_v2, %s1842_s7 }
 0x4ee   :  { %s188_s3 = scalar_lea.vmem %s2352_s2, %s2149_s15  ;;  %s220_s15 = scalar_lea.vmem %s2352_s2, %s1469_s9 }
 0x55e   :  { %v414_v4 = vpop.permute.xlu1 %413 }
 0x55f   :  { %1570 = vmatmul.mubr.msk.bf16.vlgmr.msra.gmra.mrb[4].mxu0 %vm257_vm2, %v414_v4 }
 0x560   :  { %1582 = vmatpush3.bf16.msra.mxu0 %v1934_v34  ;;  %1585 = vmatprep.mubr.msk.bf16.mxu0 %vm1840_vm0, %v1839_v3 }
 0x561   :  { %1583 = vmatprep.subr.bf16.mxu0 %v1839_v3 }
 0x564   :  { %1584 = vmatpush3.bf16.msra.mxu0 %v1937_v36 }
 0x565   :  { %1597 = vmatprep.subr.bf16.mxu0 %v1839_v3 }
 0x632   :  { %v452_v5 = vpop.f32.mrb[4].mxu0 }
 0x633   :  { %v453_v7 = vadd.f32 %v452_v5, %v1892_v6  ;;  %v1571_v8 = vpop.f32.mrb[5].mxu0  ;;  %v133_v5 = vld [vmem:[%s132_s8] sm:$0x1]  ;;  %s152_s8 = scalar_lea.vmem %s2352_s2, %s1452_s1 }
 0x634   :  { %v455_v9 = vpop.f32.mrb[6].mxu0  ;;  %134 = vst.msk [vmem:[#allocation3 + $0xc] sm:$0x1] %vm61_vm1, %v133_v5  ;;  %v141_v8 = vld [vmem:[%s140_s22] sm:$0x1]  ;;  %s160_s22 = scalar_lea.vmem %s2352_s2, %s1454_s25 }
 0x635   :  { %v459_v10 = vrot.slane %v453_v7, 6  ;;  %v1572_v11 = vpop.f32.mrb[7].mxu0  ;;  %v137_v7 = vld [vmem:[%s136_s10] sm:$0x1]  ;;  %142 = vst.msk [vmem:[#allocation3 + $0xe] sm:$0x1] %vm61_vm1, %v141_v8  ;;  %s156_s10 = scalar_lea.vmem %s2352_s2, %s1453_s24  ;;  %s168_s24 = scalar_lea.vmem %s2352_s2, %s1456_s14 }
 0x636   :  { %138 = vst.msk [vmem:[#allocation3 + $0xd] sm:$0x1] %vm61_vm1, %v137_v7  ;;  %v2075_v11 = vld [vmem:[#allocation10 + $0xcb] ss:$0 sm:$0xff] }
 0x637   :  { %468 = vrot.lane.b32.xlu0 %v459_v10, %s1841_s16  ;;  %v461_v12 = vadd.f32 %v459_v10, %v1928_v18  ;;  %v145_v10 = vld [vmem:[%s144_s11] sm:$0x1]  ;;  %s164_s11 = scalar_lea.vmem %s2352_s2, %s1455_s13  ;;  %s176_s13 = scalar_lea.vmem %s2352_s2, %s1458_s27 }
 0x638   :  { %146 = vst.msk [vmem:[#allocation3 + $0xf] sm:$0x1] %vm61_vm1, %v145_v10  ;;  %s1473_s27 = sld [smem:[#allocation8 + $0x26]] }
 0x639   :  { %v1481_v13 = vmul.f32 -1.442695, %v461_v12  ;;  %v733_v12 = vld [vmem:[#allocation10 + $0x40] sm:$0xff] }
 0x63b   :  { %1694 = vpow2.f32 %v1481_v13  ;;  %v734_v13 = vld [vmem:[#allocation10 + $0x48] sm:$0xff] }
 0x645   :  { %v1695_v14 = vpop.eup %1694 }
 0x646   :  { %v465_v15 = vadd.f32 1.0, %v1695_v14  ;;  %v737_v14 = vpack.c.bf16 %v734_v13, %v733_v12 }
 0x648   :  { %1696 = vrcp.f32 %v465_v15  ;;  %v735_v15 = vld [vmem:[#allocation10 + $0x50] sm:$0xff] }
 0x652   :  { %v1697_v16 = vpop.eup %1696 }
 0x653   :  { %v478_v24 = vsub.f32 1.0, %v1697_v16  ;;  %v487_v26 = vmul.f32 %v1697_v16, %v485_v23 }
 0x6a9   :  { %v469_v17 = vpop.permute.xlu0 %468 }
 0x6aa   :  { %v471_v19 = vmul.f32 %v1697_v16, %v469_v17  ;;  %v736_v16 = vld [vmem:[#allocation10 + $0x58] sm:$0xff] }
 0x6ac   :  { %473 = vrot.lane.b32.xlu1 %v471_v19, %s1841_s16  ;;  %v738_v19 = vpack.c.bf16 %v736_v16, %v735_v15 }
 0x71e   :  { %v474_v20 = vpop.permute.xlu1 %473 }
 0x71f   :  { %v476_v21 = vadd.f32 %v474_v20, %v1928_v18  ;;  %v728_v20 = vld [vmem:[#allocation3] sm:$0xff] }
 0x721   :  { %1698 = vtanh.f32 %v476_v21  ;;  %v729_v21 = vld [vmem:[#allocation3 + $0x8] sm:$0xff] }
 0x72b   :  { %v1699_v22 = vpop.eup %1698 }
 0x72c   :  { %480 = vrot.lane.b32.xlu0 %v1699_v22, %s1842_s7  ;;  %v741_v22 = vpack.c.bf16 %v729_v21, %v728_v20 }
 0x79e   :  { %v481_v25 = vpop.permute.xlu0 %480 }
 0x79f   :  { %v483_v27 = vmul.f32 %v481_v25, %v478_v24 }
 0x7a1   :  { %v1975_v28 = vadd.f32 %v487_v26, %v483_v27 }
 0x7a3   :  { %v489_v29 = vpack.c.bf16 %v1975_v28, %v1975_v28  ;;  %v564_v56 = vrot.slane %v1975_v28, 7 }
 0x7a5   :  { %v491_v30 = vrot.slane %v489_v29, 1  ;;  %v2089_v29 = vld [vmem:[#allocation10 + $0xca] ss:$0 sm:$0xff] }
 0x7a7   :  { %492 = vrot.lane.b32.xlu1 %v491_v30, %s1842_s7 }
 0x819   :  { %v493_v31 = vpop.permute.xlu1 %492 }
 0x81a   :  { %1578 = vmatmul.mubr.msk.bf16.vlgmr.msra.gmra.mrb[4].mxu1 %vm257_vm2, %v493_v31 }
 0x81b   :  { %1590 = vmatpush3.bf16.msra.mxu1 %v1934_v34  ;;  %1593 = vmatprep.mubr.msk.bf16.mxu1 %vm1840_vm0, %v1839_v3 }
 0x81c   :  { %1591 = vmatprep.subr.bf16.mxu1 %v1839_v3 }
 0x81f   :  { %1592 = vmatpush3.bf16.msra.mxu1 %v1937_v36 }
 0x820   :  { %1613 = vmatprep.subr.bf16.mxu1 %v1839_v3 }
 0x8ed   :  { %v531_v32 = vpop.f32.mrb[4].mxu1 }
 0x8ee   :  { %v532_v33 = vadd.f32 %v531_v32, %v1892_v6  ;;  %v1579_v35 = vpop.f32.mrb[5].mxu1 }
 0x8ef   :  { %v534_v37 = vpop.f32.mrb[6].mxu1 }
 0x8f0   :  { %v538_v38 = vrot.slane %v532_v33, 5  ;;  %v1580_v39 = vpop.f32.mrb[7].mxu1 }
 0x8f2   :  { %547 = vrot.lane.b32.xlu0 %v538_v38, %s1841_s16  ;;  %v540_v34 = vadd.f32 %v538_v38, %v1928_v18 }
 0x8f4   :  { %v1483_v40 = vmul.f32 -1.442695, %v540_v34 }
 0x8f6   :  { %1700 = vpow2.f32 %v1483_v40 }
 0x900   :  { %v1701_v41 = vpop.eup %1700 }
 0x901   :  { %v544_v42 = vadd.f32 1.0, %v1701_v41 }
 0x903   :  { %1702 = vrcp.f32 %v544_v42 }
 0x90d   :  { %v1703_v43 = vpop.eup %1702 }
 0x90e   :  { %v557_v57 = vsub.f32 1.0, %v1703_v43  ;;  %v566_v62 = vmul.f32 %v1703_v43, %v564_v56 }
 0x964   :  { %v548_v36 = vpop.permute.xlu0 %547 }
 0x965   :  { %v550_v44 = vmul.f32 %v1703_v43, %v548_v36 }
 0x967   :  { %552 = vrot.lane.b32.xlu1 %v550_v44, %s1841_s16 }
 0x9d9   :  { %v553_v45 = vpop.permute.xlu1 %552 }
 0x9da   :  { %v555_v46 = vadd.f32 %v553_v45, %v1928_v18 }
 0x9dc   :  { %1704 = vtanh.f32 %v555_v46 }
 0x9e6   :  { %v1705_v47 = vpop.eup %1704 }
 0x9e7   :  { %559 = vrot.lane.b32.xlu0 %v1705_v47, %s1842_s7 }
 0xa59   :  { %v560_v60 = vpop.permute.xlu0 %559 }
 0xa5a   :  { %v562_v63 = vmul.f32 %v560_v60, %v557_v57  ;;  %v814_v60 = vld [vmem:[#allocation10 + $0x68] sm:$0xff] }
 0xa5b   :  { %v2106_v61 = vpack.c.bf16 %v814_v60, %v813_v59 }
 0xa5c   :  { %v2054_v1 = vadd.f32 %v566_v62, %v562_v63  ;;  %v815_v62 = vld [vmem:[#allocation10 + $0x70] sm:$0xff]  ;;  %v816_v63 = vld [vmem:[#allocation10 + $0x78] sm:$0xff] }
 0xa5e   :  { %v568_v2 = vpack.c.bf16 %v2054_v1, %v2054_v1  ;;  %v645_v0 = vrot.slane %v2054_v1, 7 }
 0xa60   :  { %v570_v4 = vshrl.u32 %v568_v2, 16 }
 0xa62   :  { %v572_v9 = vrot.slane %v570_v4, 1  ;;  %v2111_v4 = vpack.c.bf16 %v816_v63, %v815_v62 }
 0xa64   :  { %573 = vrot.lane.b32.xlu1 %v572_v9, %s1842_s7 }
 0xa68   :  { %831 = vrot.lane.b32.xlu1 %v2075_v11, %s1841_s16 }
 0xad6   :  { %v574_v17 = vpop.permute.xlu1 %573 }
 0xad7   :  { %1586 = vmatmul.mubr.msk.bf16.vlgmr.msra.gmra.mrb[8].mxu0 %vm257_vm2, %v574_v17 }
 0xad8   :  { %1598 = vmatpush3.bf16.msra.mxu0 %v737_v14  ;;  %1601 = vmatprep.mubr.msk.bf16.mxu0 %vm1840_vm0, %v1839_v3 }
 0xad9   :  { %1599 = vmatprep.subr.bf16.mxu0 %v1839_v3 }
 0xada   :  { %v832_v40 = vpop.permute.xlu1 %831 }
 0xadc   :  { %1600 = vmatpush3.bf16.msra.mxu0 %v738_v19 }
 0xadd   :  { %1637 = vmatprep.subr.bf16.mxu0 %v1839_v3 }
 0xadf   :  { %1602 = vmatmul.mubr.msk.bf16.vlgmr.msra.gmra.mrb[12].mxu0 %vm257_vm2, %v741_v22 }
 0xae0   :  { %1605 = vmatprep.mubr.msk.bf16.mxu0 %vm1840_vm0, %v1839_v3  ;;  %1638 = vmatpush3.bf16.msra.mxu0 %v2106_v61 }
 0xae1   :  { %1639 = vmatprep.subr.bf16.mxu0 %v1839_v3 }
 0xae4   :  { %1640 = vmatpush3.bf16.msra.mxu0 %v2111_v4 }
 0xae5   :  { %1653 = vmatprep.subr.bf16.mxu0 %v1839_v3 }
 0xbaa   :  { %v612_v23 = vpop.f32.mrb[8].mxu0 }
 0xbab   :  { %v613_v24 = vadd.f32 %v612_v23, %v1892_v6  ;;  %v1587_v25 = vpop.f32.mrb[9].mxu0 }
 0xbac   :  { %v615_v26 = vpop.f32.mrb[10].mxu0 }
 0xbad   :  { %v619_v27 = vrot.slane %v613_v24, 4  ;;  %v1588_v28 = vpop.f32.mrb[11].mxu0 }
 0xbaf   :  { %628 = vrot.lane.b32.xlu0 %v619_v27, %s1841_s16  ;;  %v621_v43 = vadd.f32 %v619_v27, %v1928_v18 }
 0xbb1   :  { %v1485_v36 = vmul.f32 -1.442695, %v621_v43  ;;  %v173_v43 = vld [vmem:[%s172_s5] sm:$0x1] }
 0xbb2   :  { %v791_v30 = vpop.f32.mrb[12].mxu0  ;;  %174 = vst.msk [vmem:[#allocation3 + $0x16] sm:$0x1] %vm61_vm1, %v173_v43  ;;  %v1139_v43 = vld [vmem:[#allocation10 + $0x80] sm:$0xff] }
 0xbb3   :  { %v792_v31 = vadd.f32 %v2089_v29, %v791_v30  ;;  %v1603_v32 = vpop.f32.mrb[13].mxu0 }
 0xbb4   :  { %v2092_v33 = vpop.f32.mrb[14].mxu0 }
 0xbb5   :  { %v823_v35 = vadd.f32 %v2075_v11, %v792_v31  ;;  %v1604_v37 = vpop.f32.mrb[15].mxu0  ;;  %v795_v24 = vadd.f32 %v2089_v29, %v2092_v33  ;;  %v149_v33 = vld [vmem:[%s148_s18] sm:$0x1]  ;;  %s204_s18 = scalar_lea.vmem %s2352_s2, %s1465_s0 }
 0xbb6   :  { %150 = vst.msk [vmem:[#allocation3 + $0x10] sm:$0x1] %vm61_vm1, %v149_v33 }
 0xbb7   :  { %v1493_v38 = vmul.f32 -1.442695, %v823_v35 }
 0xbb9   :  { %1706 = vpow2.f32 %v1493_v38 }
 0xbc3   :  { %v1707_v39 = vpop.eup %1706 }
 0xbc4   :  { %v827_v34 = vadd.f32 1.0, %v1707_v39  ;;  %v153_v39 = vld [vmem:[%s152_s8] sm:$0x1]  ;;  %s180_s8 = scalar_lea.vmem %s2352_s2, %s2145_s28  ;;  %s1463_s28 = sld [smem:[#allocation8 + $0x1c]] }
 0xbc5   :  { %154 = vst.msk [vmem:[#allocation3 + $0x11] sm:$0x1] %vm61_vm1, %v153_v39 }
 0xbc6   :  { %1708 = vrcp.f32 %v827_v34  ;;  %v157_v34 = vld [vmem:[%s156_s10] sm:$0x1]  ;;  %s184_s10 = scalar_lea.vmem %s2352_s2, %s2147_s29  ;;  %s1464_s29 = sld [smem:[#allocation8 + $0x1d]] }
 0xbc7   :  { %1710 = vpow2.f32 %v1485_v36  ;;  %158 = vst.msk [vmem:[#allocation3 + $0x12] sm:$0x1] %vm61_vm1, %v157_v34  ;;  %v177_v36 = vld [vmem:[%s176_s13] sm:$0x1]  ;;  %s232_s13 = scalar_lea.vmem %s2352_s2, %s1472_s26 }
 0xbc8   :  { %178 = vst.msk [vmem:[#allocation3 + $0x17] sm:$0x1] %vm61_vm1, %v177_v36  ;;  %v1140_v36 = vld [vmem:[#allocation10 + $0x88] sm:$0xff] }
 0xbca   :  { %s196_s1 = scalar_lea.vmem %s2352_s2, %s1463_s28 }
 0xbcc   :  { %s200_s25 = scalar_lea.vmem %s2352_s2, %s1464_s29 }
 0xbd0   :  { %v1709_v41 = vpop.eup %1708 }
 0xbd1   :  { %v834_v42 = vmul.f32 %v1709_v41, %v832_v40  ;;  %v1711_v44 = vpop.eup %1710  ;;  %v841_v55 = vsub.f32 1.0, %v1709_v41  ;;  %v161_v40 = vld [vmem:[%s160_s22] sm:$0x1] }
 0xbd2   :  { %v625_v45 = vadd.f32 1.0, %v1711_v44  ;;  %162 = vst.msk [vmem:[#allocation3 + $0x13] sm:$0x1] %vm61_vm1, %v161_v40  ;;  %v165_v41 = vld [vmem:[%s164_s11] sm:$0x1]  ;;  %s1466_s11 = sld [smem:[#allocation8 + $0x1f]] }
 0xbd3   :  { %836 = vrot.lane.b32.xlu1 %v834_v42, %s1841_s16  ;;  %v169_v42 = vld [vmem:[%s168_s24] sm:$0x1]  ;;  %166 = vst.msk [vmem:[#allocation3 + $0x14] sm:$0x1] %vm61_vm1, %v165_v41  ;;  %s224_s24 = scalar_lea.vmem %s2352_s2, %s1470_s20 }
 0xbd4   :  { %1712 = vrcp.f32 %v625_v45  ;;  %170 = vst.msk [vmem:[#allocation3 + $0x15] sm:$0x1] %vm61_vm1, %v169_v42  ;;  %v181_v44 = vld [vmem:[%s180_s8] sm:$0x1]  ;;  %s1468_s8 = sld [smem:[#allocation8 + $0x21]] }
 0xbd5   :  { %v185_v45 = vld [vmem:[%s184_s10] sm:$0x1]  ;;  %182 = vst.msk [vmem:[#allocation3 + $0x18] sm:$0x1] %vm61_vm1, %v181_v44  ;;  %s1471_s10 = sld [smem:[#allocation8 + $0x24]] }
 0xbd6   :  { %186 = vst.msk [vmem:[#allocation3 + $0x19] sm:$0x1] %vm61_vm1, %v185_v45  ;;  %v1141_v44 = vld [vmem:[#allocation10 + $0x90] sm:$0xff]  ;;  %v1143_v45 = vpack.c.bf16 %v1140_v36, %v1139_v43 }
 0xbd8   :  { %s208_s14 = scalar_lea.vmem %s2352_s2, %s1466_s11 }
 0xbda   :  { %s216_s0 = scalar_lea.vmem %s2352_s2, %s1468_s8  ;;  %s236_s8 = scalar_lea.vmem %s2352_s2, %s1473_s27 }
 0xbdb   :  { %s228_s5 = scalar_lea.vmem %s2352_s2, %s1471_s10 }
 0xbde   :  { %v1713_v46 = vpop.eup %1712 }
 0xbdf   :  { %v638_v2 = vsub.f32 1.0, %v1713_v46  ;;  %v647_v7 = vmul.f32 %v1713_v46, %v645_v0 }
 0xc21   :  { %v629_v47 = vpop.permute.xlu0 %628 }
 0xc22   :  { %v631_v48 = vmul.f32 %v1713_v46, %v629_v47  ;;  %v189_v46 = vld [vmem:[%s188_s3] sm:$0x1]  ;;  %s1474_s3 = sld [smem:[#allocation8 + $0x27]] }
 0xc23   :  { %v193_v47 = vld [vmem:[%s192_s23] sm:$0x1]  ;;  %190 = vst.msk [vmem:[#allocation3 + $0x1a] sm:$0x1] %vm61_vm1, %v189_v46  ;;  %v1142_v46 = vld [vmem:[#allocation10 + $0x98] sm:$0xff]  ;;  %s212_s23 = scalar_lea.vmem %s2352_s2, %s1467_s6 }
 0xc24   :  { %633 = vrot.lane.b32.xlu0 %v631_v48, %s1841_s16  ;;  %194 = vst.msk [vmem:[#allocation3 + $0x1b] sm:$0x1] %vm61_vm1, %v193_v47  ;;  %v197_v48 = vld [vmem:[%s196_s1] sm:$0x1]  ;;  %v1144_v47 = vpack.c.bf16 %v1142_v46, %v1141_v44 }
 0xc25   :  { %198 = vst.msk [vmem:[#allocation3 + $0x1c] sm:$0x1] %vm61_vm1, %v197_v48 }
 0xc28   :  { %s240_s21 = scalar_lea.vmem %s2352_s2, %s1474_s3  ;;  %s1845_s2 = smov [#allocation11]  }
 0xc45   :  { %v837_v49 = vpop.permute.xlu1 %836 }
 0xc46   :  { %v839_v50 = vadd.f32 %v837_v49, %v792_v31  ;;  %v201_v49 = vld [vmem:[%s200_s25] sm:$0x1] }
 0xc47   :  { %202 = vst.msk [vmem:[#allocation3 + $0x1d] sm:$0x1] %vm61_vm1, %v201_v49 }
 0xc48   :  { %1714 = vtanh.f32 %v839_v50  ;;  %v205_v50 = vld [vmem:[%s204_s18] sm:$0x1] }
 0xc49   :  { %206 = vst.msk [vmem:[#allocation3 + $0x1e] sm:$0x1] %vm61_vm1, %v205_v50 }
 0xc52   :  { %v1715_v51 = vpop.eup %1714 }
 0xc53   :  { %843 = vrot.lane.b32.xlu1 %v1715_v51, %s1842_s7  ;;  %v209_v51 = vld [vmem:[%s208_s14] sm:$0x1] }
 0xc54   :  { %210 = vst.msk [vmem:[#allocation3 + $0x1f] sm:$0x1] %vm61_vm1, %v209_v51 }
 0xc5b   :  { %v731_v60 = vld [vmem:[#allocation3 + $0x18] sm:$0xff] }
 0xc96   :  { %v634_v52 = vpop.permute.xlu0 %633 }
 0xc97   :  { %v636_v53 = vadd.f32 %v634_v52, %v1928_v18 }
 0xc99   :  { %1716 = vtanh.f32 %v636_v53 }
 0xca3   :  { %v1717_v54 = vpop.eup %1716 }
 0xca4   :  { %640 = vrot.lane.b32.xlu0 %v1717_v54, %s1842_s7 }
 0xcc5   :  { %v844_v56 = vpop.permute.xlu1 %843 }
 0xcc6   :  { %v2101_v57 = vmul.f32 %v844_v56, %v841_v55 }
 0xcc8   :  { %v847_v58 = vpack.c.bf16 %v2101_v57, %v2101_v57 }
 0xcca   :  { %849 = vrot.lane.b32.xlu1 %v847_v58, %s1842_s7  ;;  %v730_v58 = vld [vmem:[#allocation3 + $0x10] sm:$0xff] }
 0xccb   :  { %v742_v62 = vpack.c.bf16 %v731_v60, %v730_v58 }
 0xccd   :  { %1606 = vmatmul.mubr.msk.bf16.gmra.mrb[16].mxu0 %vm257_vm2, %v742_v62 }
 0xcce   :  { %1609 = vmatprep.mubr.msk.bf16.mxu0 %vm1840_vm0, %v1839_v3 }
 0xd16   :  { %v641_v5 = vpop.permute.xlu0 %640 }
 0xd17   :  { %v643_v8 = vmul.f32 %v641_v5, %v638_v2 }
 0xd19   :  { %v2115_v9 = vadd.f32 %v647_v7, %v643_v8 }
 0xd1b   :  { %v649_v10 = vpack.c.bf16 %v2115_v9, %v2115_v9 }
 0xd1d   :  { %v651_v12 = vrot.slane %v649_v10, 2 }
 0xd1f   :  { %652 = vrot.lane.b32.xlu0 %v651_v12, %s1842_s7 }
 0xd3c   :  { %v850_v1 = vpop.permute.xlu1 %849 }
 0xd91   :  { %v653_v13 = vpop.permute.xlu0 %652 }
 0xd92   :  { %1594 = vmatmul.mubr.msk.bf16.vlgmr.msra.gmra.mrb[8].mxu1 %vm257_vm2, %v653_v13 }
 0xd93   :  { %1614 = vmatpush3.bf16.msra.mxu1 %v2106_v61  ;;  %1617 = vmatprep.mubr.msk.bf16.mxu1 %vm1840_vm0, %v1839_v3 }
 0xd94   :  { %1615 = vmatprep.subr.bf16.mxu1 %v1839_v3 }
 0xd97   :  { %1616 = vmatpush3.bf16.msra.mxu1 %v2111_v4 }
 0xd98   :  { %1621 = vmatprep.subr.bf16.mxu1 %v1839_v3 }
 0xd9a   :  { %1618 = vmatmul.mubr.msk.bf16.vlgmr.msra.gmra.mrb[12].mxu1 %vm257_vm2, %v850_v1 }
 0xd9b   :  { %1622 = vmatpush3.bf16.msra.mxu1 %v2106_v61  ;;  %1625 = vmatprep.mubr.msk.bf16.mxu1 %vm1840_vm0, %v1839_v3 }
 0xd9c   :  { %1623 = vmatprep.subr.bf16.mxu1 %v1839_v3 }
 0xd9f   :  { %1624 = vmatpush3.bf16.msra.mxu1 %v2111_v4 }
 0xda0   :  { %1629 = vmatprep.subr.bf16.mxu1 %v1839_v3 }
 0xe65   :  { %v2134_v14 = vpop.f32.mrb[8].mxu1 }
 0xe66   :  { %v1595_v15 = vpop.f32.mrb[9].mxu1 }
 0xe67   :  { %v694_v16 = vpop.f32.mrb[10].mxu1 }
 0xe68   :  { %v1596_v17 = vpop.f32.mrb[11].mxu1 }
 0xe6d   :  { %v888_v19 = vpop.f32.mrb[12].mxu1 }
 0xe6e   :  { %v889_v20 = vadd.f32 %v2075_v11, %v888_v19  ;;  %v1619_v21 = vpop.f32.mrb[13].mxu1 }
 0xe6f   :  { %v891_v22 = vpop.f32.mrb[14].mxu1 }
 0xe70   :  { %902 = vrot.lane.b32.xlu0 %v889_v20, %s1841_s16  ;;  %v1620_v23 = vpop.f32.mrb[15].mxu1  ;;  %v894_v25 = vadd.f32 %v889_v20, %v795_v24 }
 0xe71   :  { %v692_v23 = vadd.f32 %v2134_v14, %v1892_v6 }
 0xe72   :  { %v1495_v26 = vmul.f32 -1.442695, %v894_v25 }
 0xe73   :  { %v698_v25 = vrot.slane %v692_v23, 3 }
 0xe74   :  { %1718 = vpow2.f32 %v1495_v26 }
 0xe75   :  { %v700_v26 = vadd.f32 %v698_v25, %v1928_v18 }
 0xe7e   :  { %v1719_v27 = vpop.eup %1718 }
 0xe7f   :  { %v898_v28 = vadd.f32 1.0, %v1719_v27  ;;  %v1487_v27 = vmul.f32 -1.442695, %v700_v26 }
 0xe81   :  { %1720 = vrcp.f32 %v898_v28 }
 0xe8b   :  { %v2140_v30 = vpop.eup %1720 }
 0xe8c   :  { %v912_v52 = vsub.f32 1.0, %v2140_v30  ;;  %v918_v54 = vmul.f32 %v2140_v30, %v2101_v57  ;;  %v799_v57 = vpop.f32.mrb[16].mxu0 }
 0xe8d   :  { %v1607_v0 = vpop.f32.mrb[17].mxu0  ;;  %v800_v13 = vadd.f32 %v2089_v29, %v799_v57 }
 0xe8e   :  { %v2235_v2 = vpop.f32.mrb[18].mxu0 }
 0xe8f   :  { %v1608_v5 = vpop.f32.mrb[19].mxu0  ;;  %v803_v57 = vadd.f32 %v2089_v29, %v2235_v2  ;;  %v1145_v2 = vld [vmem:[#allocation10 + $0xcc] sm:$0x1] }
 0xee2   :  { %v903_v31 = vpop.permute.xlu0 %902 }
 0xee3   :  { %v905_v32 = vmul.f32 %v2140_v30, %v903_v31 }
 0xee5   :  { %907 = vrot.lane.b32.xlu1 %v905_v32, %s1841_s16 }
 0xf57   :  { %v908_v35 = vpop.permute.xlu1 %907 }
 0xf58   :  { %v910_v37 = vadd.f32 %v908_v35, %v795_v24 }
 0xf5a   :  { %1722 = vtanh.f32 %v910_v37 }
 0xf64   :  { %v1723_v38 = vpop.eup %1722 }
 0xf65   :  { %914 = vrot.lane.b32.xlu0 %v1723_v38, %s1842_s7 }
 0xfd7   :  { %v915_v53 = vpop.permute.xlu0 %914 }
 0xfd8   :  { %v917_v55 = vmul.f32 %v915_v53, %v912_v52 }
 0xfda   :  { %v919_v56 = vadd.f32 %v918_v54, %v917_v55 }
 0xfdc   :  { %v920_v59 = vpack.c.bf16 %v919_v56, %v919_v56 }
 0xfde   :  { %922 = vrot.lane.b32.xlu1 %v920_v59, %s1842_s7 }
0x1050   :  { %v923_v63 = vpop.permute.xlu1 %922 }
0x1051   :  { %1626 = vmatmul.mubr.msk.bf16.vlgmr.msra.gmra.mrb[16].mxu1 %vm257_vm2, %v923_v63 }
0x1052   :  { %1630 = vmatpush3.bf16.msra.mxu1 %v2106_v61  ;;  %1633 = vmatprep.mubr.msk.bf16.mxu1 %vm1840_vm0, %v1839_v3 }
0x1053   :  { %1631 = vmatprep.subr.bf16.mxu1 %v1839_v3 }
0x1056   :  { %1632 = vmatpush3.bf16.msra.mxu1 %v2111_v4 }
0x1057   :  { %1645 = vmatprep.subr.bf16.mxu1 %v1839_v3 }
0x1124   :  { %v961_v7 = vpop.f32.mrb[16].mxu1 }
0x1125   :  { %v962_v8 = vadd.f32 %v2075_v11, %v961_v7  ;;  %v1627_v10 = vpop.f32.mrb[17].mxu1 }
0x1126   :  { %v964_v12 = vpop.f32.mrb[18].mxu1 }
0x1127   :  { %975 = vrot.lane.b32.xlu0 %v962_v8, %s1841_s16  ;;  %v1628_v61 = vpop.f32.mrb[19].mxu1  ;;  %v967_v1 = vadd.f32 %v962_v8, %v800_v13 }
0x1129   :  { %v1497_v15 = vmul.f32 -1.442695, %v967_v1 }
0x112b   :  { %1724 = vpow2.f32 %v1497_v15 }
0x1135   :  { %v1725_v4 = vpop.eup %1724 }
0x1136   :  { %v971_v16 = vadd.f32 1.0, %v1725_v4 }
0x1138   :  { %1726 = vrcp.f32 %v971_v16 }
0x1142   :  { %v1727_v17 = vpop.eup %1726 }
0x1143   :  { %v985_v31 = vsub.f32 1.0, %v1727_v17  ;;  %v991_v35 = vmul.f32 %v1727_v17, %v919_v56  ;;  %v1146_v56 = vld [vmem:[#allocation10 + $0xcd] sm:$0x1] }
0x1199   :  { %v976_v19 = vpop.permute.xlu0 %975 }
0x119a   :  { %v978_v20 = vmul.f32 %v1727_v17, %v976_v19 }
0x119c   :  { %980 = vrot.lane.b32.xlu1 %v978_v20, %s1841_s16 }
0x120e   :  { %v981_v21 = vpop.permute.xlu1 %980 }
0x120f   :  { %v983_v22 = vadd.f32 %v981_v21, %v800_v13 }
0x1211   :  { %1728 = vtanh.f32 %v983_v22 }
0x1212   :  { %1730 = vpow2.f32 %v1487_v27 }
0x121b   :  { %v1729_v24 = vpop.eup %1728 }
0x121c   :  { %987 = vrot.lane.b32.xlu0 %v1729_v24, %s1842_s7  ;;  %v1731_v28 = vpop.eup %1730 }
0x121d   :  { %v704_v30 = vadd.f32 1.0, %v1731_v28  ;;  %v213_v28 = vld [vmem:[%s212_s23] sm:$0x1] }
0x121e   :  { %214 = vst.msk [vmem:[#allocation3 + $0x20] sm:$0x1] %vm61_vm1, %v213_v28 }
0x121f   :  { %1732 = vrcp.f32 %v704_v30  ;;  %v217_v30 = vld [vmem:[%s216_s0] sm:$0x1] }
0x1220   :  { %707 = vrot.lane.b32.xlu0 %v698_v25, %s1841_s16  ;;  %218 = vst.msk [vmem:[#allocation3 + $0x21] sm:$0x1] %vm61_vm1, %v217_v30  ;;  %v1276_v30 = vld [vmem:[#allocation10 + $0xc0] sm:$0x1] }
0x1229   :  { %v1733_v6 = vpop.eup %1732 }
0x122a   :  { %v717_v48 = vsub.f32 1.0, %v1733_v6 }
0x128e   :  { %v988_v32 = vpop.permute.xlu0 %987 }
0x128f   :  { %v990_v37 = vmul.f32 %v988_v32, %v985_v31  ;;  %v221_v31 = vld [vmem:[%s220_s15] sm:$0x1] }
0x1290   :  { %v225_v32 = vld [vmem:[%s224_s24] sm:$0x1]  ;;  %222 = vst.msk [vmem:[#allocation3 + $0x22] sm:$0x1] %vm61_vm1, %v221_v31  ;;  %v1277_v31 = vpack.c.bf16 %v1276_v30, %v1276_v30 }
0x1291   :  { %v2246_v38 = vadd.f32 %v991_v35, %v990_v37  ;;  %226 = vst.msk [vmem:[#allocation3 + $0x23] sm:$0x1] %vm61_vm1, %v225_v32  ;;  %v229_v35 = vld [vmem:[%s228_s5] sm:$0x1] }
0x1292   :  { %v708_v14 = vpop.permute.xlu0 %707  ;;  %v233_v37 = vld [vmem:[%s232_s13] sm:$0x1]  ;;  %230 = vst.msk [vmem:[#allocation3 + $0x24] sm:$0x1] %vm61_vm1, %v229_v35 }
0x1293   :  { %v710_v33 = vmul.f32 %v1733_v6, %v708_v14  ;;  %v993_v39 = vpack.c.bf16 %v2246_v38, %v2246_v38  ;;  %234 = vst.msk [vmem:[#allocation3 + $0x25] sm:$0x1] %vm61_vm1, %v233_v37  ;;  %v241_v14 = vld [vmem:[%s240_s21] sm:$0x1] }
0x1294   :  { %242 = vst.msk [vmem:[#allocation3 + $0x27] sm:$0x1] %vm61_vm1, %v241_v14 }
0x1295   :  { %995 = vrot.lane.b32.xlu1 %v993_v39, %s1842_s7  ;;  %712 = vrot.lane.b32.xlu0 %v710_v33, %s1841_s16 }
0x1307   :  { %v996_v34 = vpop.permute.xlu1 %995  ;;  %v713_v40 = vpop.permute.xlu0 %712 }
0x1308   :  { %v715_v41 = vadd.f32 %v713_v40, %v1928_v18  ;;  %1634 = vmatmul.mubr.msk.bf16.vlgmr.msra.gmra.mrb[20].mxu1 %vm257_vm2, %v996_v34  ;;  %v724_v18 = vrot.slane %v2115_v9, 7 }
0x1309   :  { %1649 = vmatprep.mubr.msk.bf16.mxu1 %vm1840_vm0, %v1839_v3  ;;  %1646 = vmatpush3.bf16.msra.mxu1 %v1143_v45 }
0x130a   :  { %1734 = vtanh.f32 %v715_v41  ;;  %1647 = vmatprep.subr.bf16.mxu1 %v1839_v3  ;;  %v726_v50 = vmul.f32 %v1733_v6, %v724_v18  ;;  %v237_v6 = vld [vmem:[%s236_s8] sm:$0x1]  ;;  %v1222_v18 = vld [vmem:[#allocation10 + $0xa8] sm:$0xff] }
0x130b   :  { %238 = vst.msk [vmem:[#allocation3 + $0x26] sm:$0x1] %vm61_vm1, %v237_v6 }
0x130d   :  { %1648 = vmatpush3.bf16.msra.mxu1 %v1144_v47  ;;  %v1221_v47 = vld [vmem:[#allocation10 + $0xa0] sm:$0xff] }
0x130e   :  { %1661 = vmatprep.subr.bf16.mxu1 %v1839_v3 }
0x1312   :  { %v732_v33 = vld [vmem:[#allocation3 + $0x20] sm:$0xff] }
0x1313   :  { %v743_v39 = vpack.c.bf16 %v732_v33, %v732_v33 }
0x1314   :  { %v1735_v42 = vpop.eup %1734 }
0x1315   :  { %719 = vrot.lane.b32.xlu0 %v1735_v42, %s1842_s7  ;;  %1610 = vmatmul.mubr.msk.bf16.gmra.mrb[20].mxu0 %vm257_vm2, %v743_v39 }
0x1316   :  { %1641 = vmatprep.mubr.msk.bf16.mxu0 %vm1840_vm0, %v1839_v3 }
0x1387   :  { %v720_v49 = vpop.permute.xlu0 %719 }
0x1388   :  { %v722_v51 = vmul.f32 %v720_v49, %v717_v48  ;;  %v1225_v48 = vpack.c.bf16 %v1222_v18, %v1221_v47  ;;  %v1223_v49 = vld [vmem:[#allocation10 + $0xb0] sm:$0xff] }
0x138a   :  { %v727_v52 = vadd.f32 %v726_v50, %v722_v51  ;;  %v1224_v50 = vld [vmem:[#allocation10 + $0xb8] sm:$0xff] }
0x138b   :  { %v1226_v51 = vpack.c.bf16 %v1224_v50, %v1223_v49 }
0x138c   :  { %v1147_v53 = vpack.c.bf16 %v727_v52, %v727_v52 }
0x138e   :  { %v1149_v54 = vshrl.u32 %v1147_v53, 16 }
0x1390   :  { %v1151_v55 = vrot.slane %v1149_v54, 2 }
0x1392   :  { %1152 = vrot.lane.b32.xlu0 %v1151_v55, %s1842_s7 }
0x1396   :  { %1205 = vrot.lane.b32.xlu0 %v1146_v56, %s1841_s16 }
0x13db   :  { %v1034_v58 = vpop.f32.mrb[20].mxu1 }
0x13dc   :  { %v1035_v59 = vadd.f32 %v2075_v11, %v1034_v58  ;;  %v1635_v60 = vpop.f32.mrb[21].mxu1 }
0x13dd   :  { %v1037_v62 = vpop.f32.mrb[22].mxu1 }
0x13de   :  { %1048 = vrot.lane.b32.xlu1 %v1035_v59, %s1841_s16  ;;  %v1636_v9 = vpop.f32.mrb[23].mxu1  ;;  %v1040_v0 = vadd.f32 %v1035_v59, %v803_v57 }
0x13df   :  { %v1843_v9 = vmov 0  }
0x13e0   :  { %v1499_v5 = vmul.f32 -1.442695, %v1040_v0  ;;  %1679 = vset.pattern.permute.xlu0 %v1843_v9  ;;  %1680 = vset.pattern.permute.xlu1 %v1843_v9 }
0x13e2   :  { %1736 = vpow2.f32 %v1499_v5 }
0x13e8   :  { %v807_v52 = vpop.f32.mrb[20].mxu0 }
0x13e9   :  { %v1611_v53 = vpop.f32.mrb[21].mxu0 }
0x13ea   :  { %v810_v54 = vpop.f32.mrb[22].mxu0 }
0x13eb   :  { %v1612_v55 = vpop.f32.mrb[23].mxu0 }
0x13ec   :  { %v1737_v7 = vpop.eup %1736 }
0x13ed   :  { %v1044_v8 = vadd.f32 1.0, %v1737_v7  ;;  %v808_v7 = vadd.f32 %v2089_v29, %v807_v52 }
0x13ef   :  { %1738 = vrcp.f32 %v1044_v8 }
0x13f9   :  { %v2269_v10 = vpop.eup %1738 }
0x13fa   :  { %v1058_v34 = vsub.f32 1.0, %v2269_v10  ;;  %v1064_v41 = vmul.f32 %v2269_v10, %v2246_v38 }
0x1404   :  { %v1153_v63 = vpop.permute.xlu0 %1152 }
0x1405   :  { %1650 = vmatmul.mubr.msk.bf16.vlgmr.msra.gmra.mrb[24].mxu1 %vm257_vm2, %v1153_v63 }
0x1406   :  { %1663 = vmatprep.mubr.msk.bf16.mxu1 %vm1840_vm0, %v1839_v3 }
0x1408   :  { %v1206_v25 = vpop.permute.xlu0 %1205 }
0x1450   :  { %v1049_v12 = vpop.permute.xlu1 %1048 }
0x1451   :  { %v1051_v61 = vmul.f32 %v2269_v10, %v1049_v12 }
0x1453   :  { %1053 = vrot.lane.b32.xlu1 %v1051_v61, %s1841_s16 }
0x14c5   :  { %v1054_v13 = vpop.permute.xlu1 %1053 }
0x14c6   :  { %v1056_v1 = vadd.f32 %v1054_v13, %v803_v57 }
0x14c8   :  { %1740 = vtanh.f32 %v1056_v1 }
0x14d2   :  { %v1741_v15 = vpop.eup %1740 }
0x14d3   :  { %1060 = vrot.lane.b32.xlu1 %v1741_v15, %s1842_s7 }
0x14d8   :  { %v1191_v4 = vpop.f32.mrb[24].mxu1 }
0x14d9   :  { %v1192_v16 = vadd.f32 %v1191_v4, %v1145_v2  ;;  %v1651_v17 = vpop.f32.mrb[25].mxu1 }
0x14da   :  { %v1194_v19 = vpop.f32.mrb[26].mxu1 }
0x14db   :  { %v1197_v20 = vadd.f32 %v1192_v16, %v1146_v56  ;;  %v1652_v21 = vpop.f32.mrb[27].mxu1 }
0x14dd   :  { %v1503_v22 = vmul.f32 -1.442695, %v1197_v20 }
0x14df   :  { %1742 = vpow2.f32 %v1503_v22 }
0x14e9   :  { %v1743_v23 = vpop.eup %1742 }
0x14ea   :  { %v1201_v24 = vadd.f32 1.0, %v1743_v23 }
0x14ec   :  { %1744 = vrcp.f32 %v1201_v24 }
0x14f6   :  { %v2274_v26 = vpop.eup %1744 }
0x14f7   :  { %v1208_v27 = vmul.f32 %v2274_v26, %v1206_v25  ;;  %v1215_v56 = vsub.f32 1.0, %v2274_v26  ;;  %v1274_v26 = vld [vmem:[#allocation10 + $0xce] sm:$0x1] }
0x14f9   :  { %1210 = vrot.lane.b32.xlu0 %v1208_v27, %s1841_s16 }
0x1545   :  { %v1061_v40 = vpop.permute.xlu1 %1060 }
0x1546   :  { %v1063_v42 = vmul.f32 %v1061_v40, %v1058_v34 }
0x1548   :  { %v2316_v43 = vadd.f32 %v1064_v41, %v1063_v42  ;;  %v1844_v42 = vmov 1  }
0x154a   :  { %v1066_v36 = vpack.c.bf16 %v2316_v43, %v2316_v43 }
0x154c   :  { %1068 = vrot.lane.b32.xlu1 %v1066_v36, %s1842_s7 }
0x156b   :  { %v1211_v44 = vpop.permute.xlu0 %1210 }
0x156c   :  { %v1213_v45 = vadd.f32 %v1211_v44, %v1192_v16 }
0x156e   :  { %1746 = vtanh.f32 %v1213_v45 }
0x1578   :  { %v1747_v46 = vpop.eup %1746 }
0x1579   :  { %1217 = vrot.lane.b32.xlu0 %v1747_v46, %s1842_s7 }
0x15be   :  { %v1069_v38 = vpop.permute.xlu1 %1068 }
0x15bf   :  { %1642 = vmatmul.mubr.msk.bf16.vlgmr.msra.gmra.mrb[24].mxu0 %vm257_vm2, %v1069_v38 }
0x15c0   :  { %1654 = vmatpush3.bf16.msra.mxu0 %v1225_v48  ;;  %1657 = vmatprep.mubr.msk.bf16.mxu0 %vm1840_vm0, %v1839_v3 }
0x15c1   :  { %1655 = vmatprep.subr.bf16.mxu0 %v1839_v3 }
0x15c4   :  { %1656 = vmatpush3.bf16.msra.mxu0 %v1226_v51 }
0x15eb   :  { %v1218_v58 = vpop.permute.xlu0 %1217 }
0x15ec   :  { %v1220_v59 = vmul.f32 %v1218_v58, %v1215_v56 }
0x15ee   :  { %v1227_v60 = vpack.c.bf16 %v1220_v59, %v1220_v59 }
0x15f0   :  { %1229 = vrot.lane.b32.xlu0 %v1227_v60, %s1842_s7 }
0x1662   :  { %v1230_v62 = vpop.permute.xlu0 %1229 }
0x1663   :  { %1658 = vmatmul.mubr.msk.bf16.vlgmr.msra.gmra.mrb[28].mxu0 %vm257_vm2, %v1230_v62 }
0x1692   :  { %v1107_v63 = vpop.f32.mrb[24].mxu0 }
0x1693   :  { %v1108_v3 = vadd.f32 %v2075_v11, %v1107_v63  ;;  %v1643_v57 = vpop.f32.mrb[25].mxu0 }
0x1694   :  { %v1110_v0 = vpop.f32.mrb[26].mxu0 }
0x1695   :  { %1121 = vrot.lane.b32.xlu1 %v1108_v3, %s1841_s16  ;;  %v1644_v5 = vpop.f32.mrb[27].mxu0  ;;  %v1113_v8 = vadd.f32 %v1108_v3, %v808_v7 }
0x1697   :  { %v1501_v10 = vmul.f32 -1.442695, %v1113_v8 }
0x1699   :  { %1748 = vpow2.f32 %v1501_v10 }
0x16a3   :  { %v1749_v12 = vpop.eup %1748 }
0x16a4   :  { %v1117_v61 = vadd.f32 1.0, %v1749_v12 }
0x16a6   :  { %1750 = vrcp.f32 %v1117_v61 }
0x16b0   :  { %v1751_v13 = vpop.eup %1750 }
0x16b1   :  { %v1131_v20 = vsub.f32 1.0, %v1751_v13  ;;  %v1137_v22 = vmul.f32 %v1751_v13, %v2316_v43 }
0x1707   :  { %v1122_v1 = vpop.permute.xlu1 %1121 }
0x1708   :  { %v1124_v15 = vmul.f32 %v1751_v13, %v1122_v1 }
0x170a   :  { %1126 = vrot.lane.b32.xlu1 %v1124_v15, %s1841_s16  ;;  %s1374_s16 = sshll.u32 %s1845_s2, 4  ;;  %s1375_s16 = int_to_ptr.vmem [resolvable:$true] %s1374_s16 }
0x170b   :  { %p1809_p5 = scmp.lt.s32.totalorder %s1375_s16, %s1375_s16 }
0x1736   :  { %v1268_v2 = vpop.f32.mrb[28].mxu0 }
0x1737   :  { %1330 = vperm.xlu0 %1679, %v1268_v2   ;;  %v1659_v11 = vpop.f32.mrb[29].mxu0  ;;  %v1275_v47 = vadd.f32 %v1274_v26, %v1268_v2 }
0x1738   :  { %v1271_v4 = vpop.f32.mrb[30].mxu0 }
0x1739   :  { %v1660_v16 = vpop.f32.mrb[31].mxu0 }
0x173b   :  { %1681 = vset.pattern.permute.xlu0 %v1844_v42 }
0x177c   :  { %v1127_v17 = vpop.permute.xlu1 %1126 }
0x177d   :  { %v1129_v19 = vadd.f32 %v1127_v17, %v808_v7 }
0x177f   :  { %1752 = vtanh.f32 %v1129_v19 }
0x1789   :  { %v1753_v29 = vpop.eup %1752 }
0x178a   :  { %1133 = vrot.lane.b32.xlu1 %v1753_v29, %s1842_s7 }
0x17b6   :  { %v1331_v32 = vpop.permute.xlu0 %1330 }
0x17fc   :  { %v1134_v21 = vpop.permute.xlu1 %1133 }
0x17fd   :  { %v1136_v23 = vmul.f32 %v1134_v21, %v1131_v20 }
0x17ff   :  { %v1138_v24 = vadd.f32 %v1137_v22, %v1136_v23 }
0x1801   :  { %v1278_v25 = vpack.c.bf16 %v1138_v24, %v1138_v24 }
0x1803   :  { %1280 = vrot.lane.b32.xlu1 %v1278_v25, %s1842_s7  ;;  %s1804_s7 = scalar_lea.vmem %s1375_s16, 64 }
0x1804   :  { %p1805_p4 = scmp.ne.s32.totalorder %s1375_s16, %s1804_s7  ;;  %p1810_p6 = scmp.lt.s32.totalorder %s1804_s7, %s1804_s7 }
0x1806   :  { %p1811_p7 = por %p1810_p6, %p1809_p5 }
0x1807   :  { %1336 = vperm.xlu1 %1680, %v1274_v26  }
0x1808   :  { %p1812_p8 = pnand %p1811_p7, %p1805_p4 }
0x1875   :  { %v1281_v27 = vpop.permute.xlu1 %1280 }
0x1876   :  { %v1286_v28 = vsel %vm257_vm2, %v1281_v27, 0 }
0x1877   :  { %1662 = vmatpush3.bf16.xpose.msra.mxu1 %v1286_v28 }
0x187e   :  { %1664 = vmatmul.mubr.msk.bf16.vlgmr.msra.gmra.mrb[28].mxu1 %vm257_vm2, %v1277_v31 }
0x1886   :  { %v1337_v37 = vpop.permute.xlu1 %1336 }
0x1951   :  { %v1322_v35 = vpop.f32.mrb[28].mxu1 }
0x1952   :  { %v1333_v6 = vadd.f32 %v1331_v32, %v1322_v35  ;;  %v1665_v14 = vpop.f32.mrb[29].mxu1 }
0x1953   :  { %v1325_v33 = vpop.f32.mrb[30].mxu1 }
0x1954   :  { %v1339_v39 = vadd.f32 %v1337_v37, %v1333_v6  ;;  %v1666_v34 = vpop.f32.mrb[31].mxu1 }
0x1956   :  { %v1340_v40 = vmax.f32 %v1339_v39, 0.0 }
0x1958   :  { %v1342_v41 = vsel %vm1341_vm3, %v1340_v40, -inf }
0x1959   :  { %1343 = vmax.xlane.f32.xlu1 %v1342_v41 }
0x19e6   :  { %v1344_v43 = vpop.xlane.xlu1 %1343 }
0x19e7   :  { %v1345_v36 = vsub.f32 %v1340_v40, %v1344_v43 }
0x19e9   :  { %v1346_v44 = vmul.f32 1.442695, %v1345_v36 }
0x19eb   :  { %1754 = vpow2.f32 %v1346_v44 }
0x19f5   :  { %v1755_v45 = vpop.eup %1754 }
0x19f6   :  { %v1348_v46 = vsel %vm1341_vm3, %v1755_v45, 0.0 }
0x19f7   :  { %1349 = vadd.xlane.f32.xlu0 %v1348_v46 }
0x1a0d   :  { %1355 = vperm.xlu0 %1681, %v1275_v47  }
0x1a84   :  { %v1350_v18 = vpop.xlane.xlu0 %1349 }
0x1a85   :  { %1756 = vrcp.f32 %v1350_v18 }
0x1a8c   :  { %v1356_v49 = vpop.permute.xlu0 %1355 }
0x1a8d   :  { %v1360_v51 = vrot.slane %v1356_v49, 6 }
0x1a8f   :  { %v1757_v48 = vpop.eup %1756 }
0x1a90   :  { %v1352_v50 = vmul.f32 %v1757_v48, %v1755_v45 }
0x1a92   :  { %v1358_v38 = vrot.slane %v1352_v50, 7 }
0x1a94   :  { %v1363_v52 = vsel %vm1362_vm4, %v1340_v40, %v1358_v38 }
0x1a95   :  { %v1365_v53 = vsel %vm1364_vm5, %v1363_v52, %v1360_v51 }
0x1a96   :  { %1367 = vst.msk [vmem:[#allocation11] sm:$0x7] %vm1366_vm6, %v1365_v53 }
0x1a97   :  { %1815 = shalt.err (!%p1812_p8)
}
0x1a98   :  { %s1816_s27 = scalar_lea.hbm %s2354_s4, 64 }
0x1a99   :  { %p1817_p9 = scmp.ne.s32.totalorder %s2354_s4, %s1816_s27  ;;  %p1820_p10 = scmp.lt.u32.totalorder %s1816_s27, %s2354_s4 }
0x1a9b   :  { %p1822_p11 = pnand %p1820_p10, %p1817_p9 }
0x1a9d   :  { %1825 = shalt.err (!%p1822_p11)
}
0x1a9e   :  { %1377 = dma.vmem_to_hbm [thread:$0]  %s1375_s16, 64, %s2354_s4, [#allocation6]  }
0x1a9f   :  { %1832 = dma.done.wait [#allocation6], 64  }
0x1aa0   :  { %1833 = vsyncadd [#allocation6], 4294967232 }
0x1aa1   :  { %1381 = vsyncpa [#allocation5], 1 }
0x1aa2   :  { %1382 = vsyncpa [#allocation6], 1 }
0x1aa3   :  { %1383 = vsyncpa [#allocation7], 1 }
0x1aa4   :  { %1384 = vsyncpa [#allocation9], 1 }

</bundles_post_ra>
